<compile_context>
chip_gen: v7x
topology: tpu7x:2x2x1
jax: 0.10.0
libtpu: 0.0.40
codegen_flags: <defaults>
</compile_context>

<pallas_src>
import jax
import jax.numpy as jnp
from jax.experimental import pallas as pl
from jax.experimental.pallas import tpu as pltpu


LAYER_DIMS = [256, 512, 256, 256, 32, 4, 1]


def _round_up(x, m):
    return (x + m - 1) // m * m


# ---------------------------------------------------------------------------
# Kernel: full MLP forward for one batch tile; all weights resident in VMEM.
# ---------------------------------------------------------------------------
def critic_mlp_kernel(
    x_ref,
    w1, b1, w2, b2, w3, b3, w4, b4, w5, b5, w6, b6, w7, b7,
    out_ref,
):
    def affine(x_bf16, w_ref, b_ref):
        # bf16 x bf16 operands, f32 accumulation on the MXU, f32 bias add.
        return jnp.dot(x_bf16, w_ref[...],
                       preferred_element_type=jnp.float32) + b_ref[...]

    h = x_ref[...]  # already bf16, lane-dense (tb, 128)
    for w_ref, b_ref in ((w1, b1), (w2, b2), (w3, b3), (w4, b4), (w5, b5), (w6, b6)):
        # ReLU commutes with the monotone f32->bf16 cast: bit-identical result,
        # but bf16 intermediates halve VPU/vreg traffic and feed the next MXU
        # pass directly.
        h = jnp.maximum(affine(h, w_ref, b_ref).astype(jnp.bfloat16), 0.0)

    # Final layer Linear(4, 1) (lane-padded to 128): no activation, f32 out.
    out_ref[...] = affine(h, w7, b7)


# ---------------------------------------------------------------------------
# Parameter construction (PyTorch-style uniform init) + kernel-layout packing.
# ---------------------------------------------------------------------------
def init_params(key, input_dims):
    dims = [input_dims] + LAYER_DIMS
    params = []
    for i in range(len(dims) - 1):
        fan_in, fan_out = dims[i], dims[i + 1]
        key, kw, kb = jax.random.split(key, 3)
        bound = 1.0 / (fan_in ** 0.5)
        w = jax.random.uniform(kw, (fan_in, fan_out), jnp.float32, -bound, bound)
        b = jax.random.uniform(kb, (1, fan_out), jnp.float32, -bound, bound)
        params.append((w, b))
    return params


def pack_params(params):
    """f32 (W, b) list -> flat kernel arg list.

    Weights are bf16 with both input rows and output columns zero-padded up to
    multiples of 128 (lane-dense layouts everywhere); biases stay f32, zero
    padded on the lane axis.  Zero padding is numerically exact because padded
    activation lanes are ReLU(0 + 0) = 0 and padded weight rows are zero.
    """
    packed = []
    for w, b in params:
        fi, fo = w.shape
        fi_p, fo_p = _round_up(fi, 128), _round_up(fo, 128)
        wp = jnp.zeros((fi_p, fo_p), jnp.bfloat16).at[:fi, :fo].set(
            w.astype(jnp.bfloat16))
        bp = jnp.zeros((1, fo_p), jnp.float32).at[:, :fo].set(b)
        packed.extend([wp, bp])
    return packed


# ---------------------------------------------------------------------------
# Wrapper: grid over batch, weights resident (single-buffered), activations
# streamed through a lane-dense bf16 input slab.
# ---------------------------------------------------------------------------
def critic_forward(state, action, packed, *, batch_tile=1024, min_grid=2):
    B, S = state.shape
    A = action.shape[1]
    in_pad = packed[0].shape[0]    # round_up(S + A, 128)
    out_pad = packed[-1].shape[1]  # 128

    # Fused concat + lane padding -> single lane-dense bf16 input (B, in_pad).
    x = jnp.concatenate([state, action], axis=1).astype(jnp.bfloat16)
    if in_pad != S + A:
        x = jnp.pad(x, ((0, 0), (0, in_pad - (S + A))))

    # Even batch split: tiles are multiples of 8 rows, <= batch_tile rows each,
    # and >= min_grid tiles whenever the batch allows it (v7x dual-TC sharding).
    n_tiles = max(pl.cdiv(B, batch_tile), min(min_grid, pl.cdiv(B, 8)))
    tb = _round_up(pl.cdiv(B, n_tiles), 8)
    bp = _round_up(B, tb)
    if bp != B:
        x = jnp.pad(x, ((0, bp - B), (0, 0)))
    grid = (bp // tb,)

    # Weights/biases: constant block index -> VMEM-resident across grid steps;
    # single-buffered since they never change.
    weight_specs = [
        pl.BlockSpec(p.shape, lambda i: (0, 0), pipeline_mode=pl.Buffered(1))
        for p in packed
    ]
    in_specs = [pl.BlockSpec((tb, in_pad), lambda i: (i, 0)), *weight_specs]
    out_spec = pl.BlockSpec((tb, out_pad), lambda i: (i, 0))

    # Advisory cost estimate for XLA scheduling around the call.
    flops = 2 * bp * sum(int(w.shape[0]) * int(w.shape[1]) for w in packed[0::2])
    param_bytes = sum(int(p.size) * p.dtype.itemsize for p in packed)
    bytes_accessed = param_bytes + bp * in_pad * 2 + bp * out_pad * 4

    out = pl.pallas_call(
        critic_mlp_kernel,
        out_shape=jax.ShapeDtypeStruct((bp, out_pad), jnp.float32),
        grid=grid,
        in_specs=in_specs,
        out_specs=out_spec,
        compiler_params=pltpu.CompilerParams(
            dimension_semantics=("parallel",),
            vmem_limit_bytes=32 * 1024 * 1024,
        ),
        cost_estimate=pl.CostEstimate(
            flops=flops, transcendentals=0, bytes_accessed=bytes_accessed),
    )(x, *packed)

    return out[:B, :1]


# ---------------------------------------------------------------------------
# Pure-JAX reference mirroring the kernel's bf16/f32 arithmetic exactly.
# ---------------------------------------------------------------------------
def critic_forward_ref(state, action, packed):
    B, S = state.shape
    A = action.shape[1]
    in_pad = packed[0].shape[0]
    x = jnp.concatenate([state, action], axis=1).astype(jnp.bfloat16)
    if in_pad != S + A:
        x = jnp.pad(x, ((0, 0), (0, in_pad - (S + A))))

    h = x
    n_layers = len(packed) // 2
    for i in range(n_layers):
        w, b = packed[2 * i], packed[2 * i + 1]
        h32 = jnp.dot(h, w, preferred_element_type=jnp.float32) + b
        if i < n_layers - 1:
            h = jnp.maximum(h32.astype(jnp.bfloat16), 0.0)
        else:
            h = h32
    return h[:, :1]


if __name__ == "__main__":
    key = jax.random.PRNGKey(0)
    k_state, k_action, k_params = jax.random.split(key, 3)

    batch = 8
    state_dims = 12
    action_dims = 4
    input_dims = state_dims + action_dims  # nn.Linear(input_dims, 256)

    state = jax.random.normal(k_state, (batch, state_dims), jnp.float32)
    action = jax.random.normal(k_action, (batch, action_dims), jnp.float32)

    params = init_params(k_params, input_dims)
    packed = pack_params(params)

    value = critic_forward(state, action, packed)
    value = jax.block_until_ready(value)

    ref = critic_forward_ref(state, action, packed)
    assert value.shape == (batch, 1), f"bad shape {value.shape}"
    max_err = float(jnp.max(jnp.abs(value - ref)))
    assert jnp.allclose(value, ref, atol=1e-2, rtol=1e-2), (
        f"mismatch: max abs err {max_err}"
    )

    print("KERNEL_OK")
</pallas_src>

<mosaic_0001>
module attributes {stable_mosaic.version = 11 : i64} {
  func.func @critic_mlp_kernel(%arg0: i32, %arg1: memref<8x128xbf16, #tpu.memory_space<vmem>>, %arg2: memref<128x256xbf16, #tpu.memory_space<vmem>>, %arg3: memref<1x256xf32, #tpu.memory_space<vmem>>, %arg4: memref<256x512xbf16, #tpu.memory_space<vmem>>, %arg5: memref<1x512xf32, #tpu.memory_space<vmem>>, %arg6: memref<512x256xbf16, #tpu.memory_space<vmem>>, %arg7: memref<1x256xf32, #tpu.memory_space<vmem>>, %arg8: memref<256x256xbf16, #tpu.memory_space<vmem>>, %arg9: memref<1x256xf32, #tpu.memory_space<vmem>>, %arg10: memref<256x128xbf16, #tpu.memory_space<vmem>>, %arg11: memref<1x128xf32, #tpu.memory_space<vmem>>, %arg12: memref<128x128xbf16, #tpu.memory_space<vmem>>, %arg13: memref<1x128xf32, #tpu.memory_space<vmem>>, %arg14: memref<128x128xbf16, #tpu.memory_space<vmem>>, %arg15: memref<1x128xf32, #tpu.memory_space<vmem>>, %arg16: memref<8x128xf32, #tpu.memory_space<vmem>>) attributes {dimension_semantics = [#tpu.dimension_semantics<parallel>], iteration_bounds = array<i64: 1>, scalar_prefetch = 0 : i64, scratch_operands = 0 : i64, tpu.core_type = #tpu.core_type<tc>, window_params = [{transform_indices = @transform_0, window_bounds = array<i64: 8, 128>}, {pipeline_mode = #tpu.pipeline_mode<synchronous>, transform_indices = @transform_1, window_bounds = array<i64: 128, 256>}, {pipeline_mode = #tpu.pipeline_mode<synchronous>, transform_indices = @transform_2, window_bounds = array<i64: 1, 256>}, {pipeline_mode = #tpu.pipeline_mode<synchronous>, transform_indices = @transform_3, window_bounds = array<i64: 256, 512>}, {pipeline_mode = #tpu.pipeline_mode<synchronous>, transform_indices = @transform_4, window_bounds = array<i64: 1, 512>}, {pipeline_mode = #tpu.pipeline_mode<synchronous>, transform_indices = @transform_5, window_bounds = array<i64: 512, 256>}, {pipeline_mode = #tpu.pipeline_mode<synchronous>, transform_indices = @transform_6, window_bounds = array<i64: 1, 256>}, {pipeline_mode = #tpu.pipeline_mode<synchronous>, transform_indices = @transform_7, window_bounds = array<i64: 256, 256>}, {pipeline_mode = #tpu.pipeline_mode<synchronous>, transform_indices = @transform_8, window_bounds = array<i64: 1, 256>}, {pipeline_mode = #tpu.pipeline_mode<synchronous>, transform_indices = @transform_9, window_bounds = array<i64: 256, 128>}, {pipeline_mode = #tpu.pipeline_mode<synchronous>, transform_indices = @transform_10, window_bounds = array<i64: 1, 128>}, {pipeline_mode = #tpu.pipeline_mode<synchronous>, transform_indices = @transform_11, window_bounds = array<i64: 128, 128>}, {pipeline_mode = #tpu.pipeline_mode<synchronous>, transform_indices = @transform_12, window_bounds = array<i64: 1, 128>}, {pipeline_mode = #tpu.pipeline_mode<synchronous>, transform_indices = @transform_13, window_bounds = array<i64: 128, 128>}, {pipeline_mode = #tpu.pipeline_mode<synchronous>, transform_indices = @transform_14, window_bounds = array<i64: 1, 128>}, {transform_indices = @transform_15, window_bounds = array<i64: 8, 128>}]} {
    %c0 = arith.constant 0 : index
    %c0_0 = arith.constant 0 : index
    %0 = vector.load %arg1[%c0, %c0_0] : memref<8x128xbf16, #tpu.memory_space<vmem>>, vector<8x128xbf16>
    %c0_1 = arith.constant 0 : index
    %c0_2 = arith.constant 0 : index
    %1 = vector.load %arg2[%c0_1, %c0_2] : memref<128x256xbf16, #tpu.memory_space<vmem>>, vector<128x256xbf16>
    %cst = arith.constant dense<0.000000e+00> : vector<8x256xf32>
    %2 = tpu.matmul %0, %1, %cst {dimension_numbers = #tpu.dot_dimension_numbers<[1], [0], [0], [1], [0, 0, 1, 1], [], []>} : vector<8x128xbf16>, vector<128x256xbf16>, vector<8x256xf32> -> vector<8x256xf32>
    %c0_3 = arith.constant 0 : index
    %c0_4 = arith.constant 0 : index
    %3 = vector.load %arg3[%c0_3, %c0_4] : memref<1x256xf32, #tpu.memory_space<vmem>>, vector<1x256xf32>
    %4 = vector.broadcast %3 : vector<1x256xf32> to vector<8x256xf32>
    %5 = arith.addf %2, %4 : vector<8x256xf32>
    %6 = arith.truncf %5 : vector<8x256xf32> to vector<8x256xbf16>
    %cst_5 = arith.constant 0.000000e+00 : bf16
    %7 = vector.broadcast %cst_5 : bf16 to vector<8x256xbf16>
    %8 = arith.maximumf %6, %7 : vector<8x256xbf16>
    %c0_6 = arith.constant 0 : index
    %c0_7 = arith.constant 0 : index
    %9 = vector.load %arg4[%c0_6, %c0_7] : memref<256x512xbf16, #tpu.memory_space<vmem>>, vector<256x512xbf16>
    %cst_8 = arith.constant dense<0.000000e+00> : vector<8x512xf32>
    %10 = tpu.matmul %8, %9, %cst_8 {dimension_numbers = #tpu.dot_dimension_numbers<[1], [0], [0], [1], [0, 0, 1, 1], [], []>} : vector<8x256xbf16>, vector<256x512xbf16>, vector<8x512xf32> -> vector<8x512xf32>
    %c0_9 = arith.constant 0 : index
    %c0_10 = arith.constant 0 : index
    %11 = vector.load %arg5[%c0_9, %c0_10] : memref<1x512xf32, #tpu.memory_space<vmem>>, vector<1x512xf32>
    %12 = vector.broadcast %11 : vector<1x512xf32> to vector<8x512xf32>
    %13 = arith.addf %10, %12 : vector<8x512xf32>
    %14 = arith.truncf %13 : vector<8x512xf32> to vector<8x512xbf16>
    %cst_11 = arith.constant 0.000000e+00 : bf16
    %15 = vector.broadcast %cst_11 : bf16 to vector<8x512xbf16>
    %16 = arith.maximumf %14, %15 : vector<8x512xbf16>
    %c0_12 = arith.constant 0 : index
    %c0_13 = arith.constant 0 : index
    %17 = vector.load %arg6[%c0_12, %c0_13] : memref<512x256xbf16, #tpu.memory_space<vmem>>, vector<512x256xbf16>
    %cst_14 = arith.constant dense<0.000000e+00> : vector<8x256xf32>
    %18 = tpu.matmul %16, %17, %cst_14 {dimension_numbers = #tpu.dot_dimension_numbers<[1], [0], [0], [1], [0, 0, 1, 1], [], []>} : vector<8x512xbf16>, vector<512x256xbf16>, vector<8x256xf32> -> vector<8x256xf32>
    %c0_15 = arith.constant 0 : index
    %c0_16 = arith.constant 0 : index
    %19 = vector.load %arg7[%c0_15, %c0_16] : memref<1x256xf32, #tpu.memory_space<vmem>>, vector<1x256xf32>
    %20 = vector.broadcast %19 : vector<1x256xf32> to vector<8x256xf32>
    %21 = arith.addf %18, %20 : vector<8x256xf32>
    %22 = arith.truncf %21 : vector<8x256xf32> to vector<8x256xbf16>
    %cst_17 = arith.constant 0.000000e+00 : bf16
    %23 = vector.broadcast %cst_17 : bf16 to vector<8x256xbf16>
    %24 = arith.maximumf %22, %23 : vector<8x256xbf16>
    %c0_18 = arith.constant 0 : index
    %c0_19 = arith.constant 0 : index
    %25 = vector.load %arg8[%c0_18, %c0_19] : memref<256x256xbf16, #tpu.memory_space<vmem>>, vector<256x256xbf16>
    %cst_20 = arith.constant dense<0.000000e+00> : vector<8x256xf32>
    %26 = tpu.matmul %24, %25, %cst_20 {dimension_numbers = #tpu.dot_dimension_numbers<[1], [0], [0], [1], [0, 0, 1, 1], [], []>} : vector<8x256xbf16>, vector<256x256xbf16>, vector<8x256xf32> -> vector<8x256xf32>
    %c0_21 = arith.constant 0 : index
    %c0_22 = arith.constant 0 : index
    %27 = vector.load %arg9[%c0_21, %c0_22] : memref<1x256xf32, #tpu.memory_space<vmem>>, vector<1x256xf32>
    %28 = vector.broadcast %27 : vector<1x256xf32> to vector<8x256xf32>
    %29 = arith.addf %26, %28 : vector<8x256xf32>
    %30 = arith.truncf %29 : vector<8x256xf32> to vector<8x256xbf16>
    %cst_23 = arith.constant 0.000000e+00 : bf16
    %31 = vector.broadcast %cst_23 : bf16 to vector<8x256xbf16>
    %32 = arith.maximumf %30, %31 : vector<8x256xbf16>
    %c0_24 = arith.constant 0 : index
    %c0_25 = arith.constant 0 : index
    %33 = vector.load %arg10[%c0_24, %c0_25] : memref<256x128xbf16, #tpu.memory_space<vmem>>, vector<256x128xbf16>
    %cst_26 = arith.constant dense<0.000000e+00> : vector<8x128xf32>
    %34 = tpu.matmul %32, %33, %cst_26 {dimension_numbers = #tpu.dot_dimension_numbers<[1], [0], [0], [1], [0, 0, 1, 1], [], []>} : vector<8x256xbf16>, vector<256x128xbf16>, vector<8x128xf32> -> vector<8x128xf32>
    %c0_27 = arith.constant 0 : index
    %c0_28 = arith.constant 0 : index
    %35 = vector.load %arg11[%c0_27, %c0_28] : memref<1x128xf32, #tpu.memory_space<vmem>>, vector<1x128xf32>
    %36 = vector.broadcast %35 : vector<1x128xf32> to vector<8x128xf32>
    %37 = arith.addf %34, %36 : vector<8x128xf32>
    %38 = arith.truncf %37 : vector<8x128xf32> to vector<8x128xbf16>
    %cst_29 = arith.constant 0.000000e+00 : bf16
    %39 = vector.broadcast %cst_29 : bf16 to vector<8x128xbf16>
    %40 = arith.maximumf %38, %39 : vector<8x128xbf16>
    %c0_30 = arith.constant 0 : index
    %c0_31 = arith.constant 0 : index
    %41 = vector.load %arg12[%c0_30, %c0_31] : memref<128x128xbf16, #tpu.memory_space<vmem>>, vector<128x128xbf16>
    %cst_32 = arith.constant dense<0.000000e+00> : vector<8x128xf32>
    %42 = tpu.matmul %40, %41, %cst_32 {dimension_numbers = #tpu.dot_dimension_numbers<[1], [0], [0], [1], [0, 0, 1, 1], [], []>} : vector<8x128xbf16>, vector<128x128xbf16>, vector<8x128xf32> -> vector<8x128xf32>
    %c0_33 = arith.constant 0 : index
    %c0_34 = arith.constant 0 : index
    %43 = vector.load %arg13[%c0_33, %c0_34] : memref<1x128xf32, #tpu.memory_space<vmem>>, vector<1x128xf32>
    %44 = vector.broadcast %43 : vector<1x128xf32> to vector<8x128xf32>
    %45 = arith.addf %42, %44 : vector<8x128xf32>
    %46 = arith.truncf %45 : vector<8x128xf32> to vector<8x128xbf16>
    %cst_35 = arith.constant 0.000000e+00 : bf16
    %47 = vector.broadcast %cst_35 : bf16 to vector<8x128xbf16>
    %48 = arith.maximumf %46, %47 : vector<8x128xbf16>
    %c0_36 = arith.constant 0 : index
    %c0_37 = arith.constant 0 : index
    %49 = vector.load %arg14[%c0_36, %c0_37] : memref<128x128xbf16, #tpu.memory_space<vmem>>, vector<128x128xbf16>
    %cst_38 = arith.constant dense<0.000000e+00> : vector<8x128xf32>
    %50 = tpu.matmul %48, %49, %cst_38 {dimension_numbers = #tpu.dot_dimension_numbers<[1], [0], [0], [1], [0, 0, 1, 1], [], []>} : vector<8x128xbf16>, vector<128x128xbf16>, vector<8x128xf32> -> vector<8x128xf32>
    %c0_39 = arith.constant 0 : index
    %c0_40 = arith.constant 0 : index
    %51 = vector.load %arg15[%c0_39, %c0_40] : memref<1x128xf32, #tpu.memory_space<vmem>>, vector<1x128xf32>
    %52 = vector.broadcast %51 : vector<1x128xf32> to vector<8x128xf32>
    %53 = arith.addf %50, %52 : vector<8x128xf32>
    %c0_41 = arith.constant 0 : index
    %c0_42 = arith.constant 0 : index
    %54 = vector.load %arg16[%c0_41, %c0_42] : memref<8x128xf32, #tpu.memory_space<vmem>>, vector<8x128xf32>
    tpu.vector_store %arg16[%c0_41, %c0_42], %53 {strides = array<i32>} : memref<8x128xf32, #tpu.memory_space<vmem>>, vector<8x128xf32>,
    return
  }
  func.func @transform_0(%arg0: i32) -> (i32, i32) {
    %c0_i32 = arith.constant 0 : i32
    %c0_i32_0 = arith.constant 0 : i32
    return %arg0, %c0_i32 : i32, i32
  }
  func.func @transform_1(%arg0: i32) -> (i32, i32) {
    %c0_i32 = arith.constant 0 : i32
    %c0_i32_0 = arith.constant 0 : i32
    %c0_i32_1 = arith.constant 0 : i32
    return %c0_i32, %c0_i32_0 : i32, i32
  }
  func.func @transform_2(%arg0: i32) -> (i32, i32) {
    %c0_i32 = arith.constant 0 : i32
    %c0_i32_0 = arith.constant 0 : i32
    %c0_i32_1 = arith.constant 0 : i32
    return %c0_i32, %c0_i32_0 : i32, i32
  }
  func.func @transform_3(%arg0: i32) -> (i32, i32) {
    %c0_i32 = arith.constant 0 : i32
    %c0_i32_0 = arith.constant 0 : i32
    %c0_i32_1 = arith.constant 0 : i32
    return %c0_i32, %c0_i32_0 : i32, i32
  }
  func.func @transform_4(%arg0: i32) -> (i32, i32) {
    %c0_i32 = arith.constant 0 : i32
    %c0_i32_0 = arith.constant 0 : i32
    %c0_i32_1 = arith.constant 0 : i32
    return %c0_i32, %c0_i32_0 : i32, i32
  }
  func.func @transform_5(%arg0: i32) -> (i32, i32) {
    %c0_i32 = arith.constant 0 : i32
    %c0_i32_0 = arith.constant 0 : i32
    %c0_i32_1 = arith.constant 0 : i32
    return %c0_i32, %c0_i32_0 : i32, i32
  }
  func.func @transform_6(%arg0: i32) -> (i32, i32) {
    %c0_i32 = arith.constant 0 : i32
    %c0_i32_0 = arith.constant 0 : i32
    %c0_i32_1 = arith.constant 0 : i32
    return %c0_i32, %c0_i32_0 : i32, i32
  }
  func.func @transform_7(%arg0: i32) -> (i32, i32) {
    %c0_i32 = arith.constant 0 : i32
    %c0_i32_0 = arith.constant 0 : i32
    %c0_i32_1 = arith.constant 0 : i32
    return %c0_i32, %c0_i32_0 : i32, i32
  }
  func.func @transform_8(%arg0: i32) -> (i32, i32) {
    %c0_i32 = arith.constant 0 : i32
    %c0_i32_0 = arith.constant 0 : i32
    %c0_i32_1 = arith.constant 0 : i32
    return %c0_i32, %c0_i32_0 : i32, i32
  }
  func.func @transform_9(%arg0: i32) -> (i32, i32) {
    %c0_i32 = arith.constant 0 : i32
    %c0_i32_0 = arith.constant 0 : i32
    %c0_i32_1 = arith.constant 0 : i32
    return %c0_i32, %c0_i32_0 : i32, i32
  }
  func.func @transform_10(%arg0: i32) -> (i32, i32) {
    %c0_i32 = arith.constant 0 : i32
    %c0_i32_0 = arith.constant 0 : i32
    %c0_i32_1 = arith.constant 0 : i32
    return %c0_i32, %c0_i32_0 : i32, i32
  }
  func.func @transform_11(%arg0: i32) -> (i32, i32) {
    %c0_i32 = arith.constant 0 : i32
    %c0_i32_0 = arith.constant 0 : i32
    %c0_i32_1 = arith.constant 0 : i32
    return %c0_i32, %c0_i32_0 : i32, i32
  }
  func.func @transform_12(%arg0: i32) -> (i32, i32) {
    %c0_i32 = arith.constant 0 : i32
    %c0_i32_0 = arith.constant 0 : i32
    %c0_i32_1 = arith.constant 0 : i32
    return %c0_i32, %c0_i32_0 : i32, i32
  }
  func.func @transform_13(%arg0: i32) -> (i32, i32) {
    %c0_i32 = arith.constant 0 : i32
    %c0_i32_0 = arith.constant 0 : i32
    %c0_i32_1 = arith.constant 0 : i32
    return %c0_i32, %c0_i32_0 : i32, i32
  }
  func.func @transform_14(%arg0: i32) -> (i32, i32) {
    %c0_i32 = arith.constant 0 : i32
    %c0_i32_0 = arith.constant 0 : i32
    %c0_i32_1 = arith.constant 0 : i32
    return %c0_i32, %c0_i32_0 : i32, i32
  }
  func.func @transform_15(%arg0: i32) -> (i32, i32) {
    %c0_i32 = arith.constant 0 : i32
    %c0_i32_0 = arith.constant 0 : i32
    return %arg0, %c0_i32 : i32, i32
  }
}

</mosaic_0001>

<bundles_post_ra>
// kernel: tpu_custom_call.1
= control target key start
LH: loop header
LB: loop body
LE: loop exit
PB: predicated region body
PF: predicated region fallthrough
CT: control target
= control target key end

     0   :  { %s3085_s0 = inlined_call_operand.hbm [shape: bf16[8,128], index: 0, kind: input, shape index: {}]   ;;  %s3086_s1 = inlined_call_operand.hbm [shape: bf16[128,256], index: 1, kind: input, shape index: {}]   ;;  %s3087_s2 = inlined_call_operand.vmem [shape: f32[1,256], index: 2, kind: input, shape index: {}]   ;;  %s3088_s3 = inlined_call_operand.hbm [shape: bf16[256,512], index: 3, kind: input, shape index: {}]   ;;  %s3089_s4 = inlined_call_operand.vmem [shape: f32[1,512], index: 4, kind: input, shape index: {}]   ;;  %s3090_s5 = inlined_call_operand.hbm [shape: bf16[512,256], index: 5, kind: input, shape index: {}]   ;;  %s3091_s6 = inlined_call_operand.vmem [shape: f32[1,256], index: 6, kind: input, shape index: {}]   ;;  %s3092_s7 = inlined_call_operand.hbm [shape: bf16[256,256], index: 7, kind: input, shape index: {}]   ;;  %s3093_s8 = inlined_call_operand.vmem [shape: f32[1,256], index: 8, kind: input, shape index: {}]   ;;  %s3094_s9 = inlined_call_operand.hbm [shape: bf16[256,128], index: 9, kind: input, shape index: {}]   ;;  %s3095_s10 = inlined_call_operand.vmem [shape: f32[1,128], index: 10, kind: input, shape index: {}]   ;;  %s3096_s11 = inlined_call_operand.hbm [shape: bf16[128,128], index: 11, kind: input, shape index: {}]   ;;  %s3097_s12 = inlined_call_operand.vmem [shape: f32[1,128], index: 12, kind: input, shape index: {}]   ;;  %s3098_s13 = inlined_call_operand.hbm [shape: bf16[128,128], index: 13, kind: input, shape index: {}]   ;;  %s3099_s14 = inlined_call_operand.vmem [shape: f32[1,128], index: 14, kind: input, shape index: {}]   ;;  %s3100_s15 = inlined_call_operand.hbm [shape: f32[8,128], index: 15, kind: output, shape index: {}]  }
   0x1   :  { %3102 = sst [smem:[#allocation23_spill]] %s3100_s15 }
   0x2   :  { %20 = vsyncpa [#allocation3], 0 }
   0x3   :  { %21 = vsyncpa [#allocation6], 0 }
   0x4   :  { %22 = vsyncpa [#allocation9], 0 }
   0x5   :  { %23 = vsyncpa [#allocation12], 0 }
   0x6   :  { %24 = vsyncpa [#allocation15], 0 }
   0x7   :  { %25 = vsyncpa [#allocation4], 0  ;;  %s2782_s18 = smov [#allocation5]   ;;  %s2572_s22 = scalar_lea.hbm %s3086_s1, 2048 }
   0x8   :  { %s41_s19 = sshll.u32 %s2782_s18, 4  ;;  %p2573_p0 = scmp.ne.s32.totalorder %s3086_s1, %s2572_s22  ;;  %s42_s19 = int_to_ptr.vmem [resolvable:$true] %s41_s19 }
   0x9   :  { %p2576_p1 = scmp.lt.u32.totalorder %s2572_s22, %s3086_s1 }
   0xb   :  { %p2578_p2 = pnand %p2576_p1, %p2573_p0 }
   0xd   :  { %2581 = shalt.err (!%p2578_p2)
}
   0xe   :  { %s2582_s27 = scalar_lea.vmem %s42_s19, 2048  ;;  %p2587_p4 = scmp.lt.s32.totalorder %s42_s19, %s42_s19 }
   0xf   :  { %p2583_p3 = scmp.ne.s32.totalorder %s42_s19, %s2582_s27  ;;  %p2588_p5 = scmp.lt.s32.totalorder %s2582_s27, %s2582_s27 }
  0x11   :  { %p2589_p6 = por %p2588_p5, %p2587_p4 }
  0x13   :  { %p2590_p7 = pnand %p2589_p6, %p2583_p3 }
  0x15   :  { %2593 = shalt.err (!%p2590_p7)
}
  0x16   :  { %s2783_s28 = smov 128   ;;  %s2784_s29 = smov 8  }
  0x17   :  { %47 = dma.hbm_to_vmem [thread:$0]  %s3086_s1, 2048, %s42_s19, [#allocation6], %s2783_s28, %s2783_s28, %s2784_s29  }
  0x18   :  { %s2785_s17 = smov [#allocation8]   ;;  %s2786_s20 = smov [#allocation11]  }
  0x19   :  { %s69_s18 = sshll.u32 %s2785_s17, 4  ;;  %s97_s21 = sshll.u32 %s2786_s20, 4  ;;  %s70_s18 = int_to_ptr.vmem [resolvable:$true] %s69_s18  ;;  %s98_s21 = int_to_ptr.vmem [resolvable:$true] %s97_s21 }
  0x1a   :  { %s2594_s24 = scalar_lea.hbm %s3090_s5, 8192 }
  0x1b   :  { %p2595_p8 = scmp.ne.s32.totalorder %s3090_s5, %s2594_s24  ;;  %p2598_p9 = scmp.lt.u32.totalorder %s2594_s24, %s3090_s5 }
  0x1d   :  { %p2600_p10 = pnand %p2598_p9, %p2595_p8 }
  0x1f   :  { %2603 = shalt.err (!%p2600_p10)
}
  0x20   :  { %s2604_s1 = scalar_lea.vmem %s70_s18, 8192  ;;  %p2609_p12 = scmp.lt.s32.totalorder %s70_s18, %s70_s18 }
  0x21   :  { %p2605_p11 = scmp.ne.s32.totalorder %s70_s18, %s2604_s1  ;;  %p2610_p13 = scmp.lt.s32.totalorder %s2604_s1, %s2604_s1 }
  0x23   :  { %p2611_p0 = por %p2610_p13, %p2609_p12 }
  0x25   :  { %p2612_p1 = pnand %p2611_p0, %p2605_p11 }
  0x27   :  { %2615 = shalt.err (!%p2612_p1)
}
  0x28   :  { %75 = dma.hbm_to_vmem [thread:$0]  %s3090_s5, 8192, %s70_s18, [#allocation9], %s2783_s28, %s2783_s28, %s2784_s29  }
  0x29   :  { %s2616_s17 = scalar_lea.hbm %s3094_s9, 2048 }
  0x2a   :  { %p2617_p2 = scmp.ne.s32.totalorder %s3094_s9, %s2616_s17  ;;  %p2620_p3 = scmp.lt.u32.totalorder %s2616_s17, %s3094_s9 }
  0x2c   :  { %p2622_p4 = pnand %p2620_p3, %p2617_p2 }
  0x2e   :  { %2625 = shalt.err (!%p2622_p4)
}
  0x2f   :  { %s2626_s25 = scalar_lea.vmem %s98_s21, 2048  ;;  %p2631_p6 = scmp.lt.s32.totalorder %s98_s21, %s98_s21 }
  0x30   :  { %p2627_p5 = scmp.ne.s32.totalorder %s98_s21, %s2626_s25  ;;  %p2632_p7 = scmp.lt.s32.totalorder %s2626_s25, %s2626_s25 }
  0x32   :  { %p2633_p8 = por %p2632_p7, %p2631_p6 }
  0x34   :  { %p2634_p9 = pnand %p2633_p8, %p2627_p5 }
  0x36   :  { %2637 = shalt.err (!%p2634_p9)
}
  0x37   :  { %s2787_s5 = smov 64   ;;  %s2788_s18 = smov 4  }
  0x38   :  { %103 = dma.hbm_to_vmem [thread:$0]  %s3094_s9, 2048, %s98_s21, [#allocation12], %s2787_s5, %s2787_s5, %s2788_s18  }
  0x39   :  { %s2789_s1 = smov [#allocation2]   ;;  %s2790_s30 = smov [#allocation7]  }
  0x3a   :  { %s32_s19 = sshll.u32 %s2789_s1, 4  ;;  %s55_s16 = sshll.u32 %s2790_s30, 4  ;;  %s33_s19 = int_to_ptr.vmem [resolvable:$true] %s32_s19  ;;  %s56_s16 = int_to_ptr.vmem [resolvable:$true] %s55_s16 }
  0x3b   :  { %s2638_s20 = scalar_lea.hbm %s3085_s0, 64 }
  0x3c   :  { %p2639_p10 = scmp.ne.s32.totalorder %s3085_s0, %s2638_s20  ;;  %p2642_p11 = scmp.lt.u32.totalorder %s2638_s20, %s3085_s0 }
  0x3e   :  { %p2644_p12 = pnand %p2642_p11, %p2639_p10 }
  0x40   :  { %2647 = shalt.err (!%p2644_p12)
}
  0x41   :  { %s2648_s9 = scalar_lea.vmem %s33_s19, 64  ;;  %p2653_p0 = scmp.lt.s32.totalorder %s33_s19, %s33_s19 }
  0x42   :  { %p2649_p13 = scmp.ne.s32.totalorder %s33_s19, %s2648_s9  ;;  %p2654_p1 = scmp.lt.s32.totalorder %s2648_s9, %s2648_s9 }
  0x44   :  { %p2655_p2 = por %p2654_p1, %p2653_p0 }
  0x46   :  { %p2656_p3 = pnand %p2655_p2, %p2649_p13 }
  0x48   :  { %2659 = shalt.err (!%p2656_p3)
}
  0x49   :  { %35 = dma.hbm_to_vmem [thread:$0]  %s3085_s0, 64, %s33_s19, [#allocation3]  }
  0x4a   :  { %s2660_s30 = scalar_lea.hbm %s3088_s3, 8192 }
  0x4b   :  { %p2661_p4 = scmp.ne.s32.totalorder %s3088_s3, %s2660_s30  ;;  %p2664_p5 = scmp.lt.u32.totalorder %s2660_s30, %s3088_s3 }
  0x4d   :  { %p2666_p6 = pnand %p2664_p5, %p2661_p4 }
  0x4f   :  { %2669 = shalt.err (!%p2666_p6)
}
  0x50   :  { %s2670_s23 = scalar_lea.vmem %s56_s16, 8192  ;;  %p2675_p8 = scmp.lt.s32.totalorder %s56_s16, %s56_s16 }
  0x51   :  { %p2671_p7 = scmp.ne.s32.totalorder %s56_s16, %s2670_s23  ;;  %p2676_p9 = scmp.lt.s32.totalorder %s2670_s23, %s2670_s23 }
  0x53   :  { %p2677_p10 = por %p2676_p9, %p2675_p8 }
  0x55   :  { %p2678_p11 = pnand %p2677_p10, %p2671_p7 }
  0x57   :  { %2681 = shalt.err (!%p2678_p11)
}
  0x58   :  { %s2791_s0 = smov 256   ;;  %s2792_s19 = smov 16  }
  0x59   :  { %61 = dma.hbm_to_vmem [thread:$0]  %s3088_s3, 8192, %s56_s16, [#allocation6], %s2791_s0, %s2791_s0, %s2792_s19  }
  0x5a   :  { %s2793_s9 = smov [#allocation10]   ;;  %s2794_s26 = smov [#allocation13]  }
  0x5b   :  { %s83_s21 = sshll.u32 %s2793_s9, 4  ;;  %s111_s27 = sshll.u32 %s2794_s26, 4  ;;  %s84_s21 = int_to_ptr.vmem [resolvable:$true] %s83_s21  ;;  %s112_s27 = int_to_ptr.vmem [resolvable:$true] %s111_s27 }
  0x5c   :  { %s2682_s15 = scalar_lea.hbm %s3092_s7, 4096 }
  0x5d   :  { %p2683_p12 = scmp.ne.s32.totalorder %s3092_s7, %s2682_s15  ;;  %p2686_p13 = scmp.lt.u32.totalorder %s2682_s15, %s3092_s7 }
  0x5f   :  { %p2688_p0 = pnand %p2686_p13, %p2683_p12 }
  0x61   :  { %2691 = shalt.err (!%p2688_p0)
}
  0x62   :  { %s2692_s3 = scalar_lea.vmem %s84_s21, 4096  ;;  %p2697_p2 = scmp.lt.s32.totalorder %s84_s21, %s84_s21 }
  0x63   :  { %p2693_p1 = scmp.ne.s32.totalorder %s84_s21, %s2692_s3  ;;  %p2698_p3 = scmp.lt.s32.totalorder %s2692_s3, %s2692_s3 }
  0x65   :  { %p2699_p4 = por %p2698_p3, %p2697_p2 }
  0x67   :  { %p2700_p5 = pnand %p2699_p4, %p2693_p1 }
  0x69   :  { %2703 = shalt.err (!%p2700_p5)
}
  0x6a   :  { %89 = dma.hbm_to_vmem [thread:$0]  %s3092_s7, 4096, %s84_s21, [#allocation9], %s2783_s28, %s2783_s28, %s2784_s29  }
  0x6b   :  { %s2704_s25 = scalar_lea.hbm %s3096_s11, 1024 }
  0x6c   :  { %p2705_p6 = scmp.ne.s32.totalorder %s3096_s11, %s2704_s25  ;;  %p2708_p7 = scmp.lt.u32.totalorder %s2704_s25, %s3096_s11 }
  0x6e   :  { %p2710_p8 = pnand %p2708_p7, %p2705_p6 }
  0x70   :  { %2713 = shalt.err (!%p2710_p8)
}
  0x71   :  { %s2714_s15 = scalar_lea.vmem %s112_s27, 1024  ;;  %p2719_p10 = scmp.lt.s32.totalorder %s112_s27, %s112_s27 }
  0x72   :  { %p2715_p9 = scmp.ne.s32.totalorder %s112_s27, %s2714_s15  ;;  %p2720_p11 = scmp.lt.s32.totalorder %s2714_s15, %s2714_s15 }
  0x74   :  { %p2721_p12 = por %p2720_p11, %p2719_p10 }
  0x76   :  { %p2722_p13 = pnand %p2721_p12, %p2715_p9 }
  0x78   :  { %2725 = shalt.err (!%p2722_p13)
}
  0x79   :  { %117 = dma.hbm_to_vmem [thread:$0]  %s3096_s11, 1024, %s112_s27, [#allocation12], %s2787_s5, %s2787_s5, %s2788_s18  }
  0x7a   :  { %s2795_s29 = smov [#allocation14]   ;;  %s2726_s22 = scalar_lea.hbm %s3098_s13, 1024 }
  0x7b   :  { %s125_s21 = sshll.u32 %s2795_s29, 4  ;;  %p2727_p0 = scmp.ne.s32.totalorder %s3098_s13, %s2726_s22  ;;  %s126_s21 = int_to_ptr.vmem [resolvable:$true] %s125_s21 }
  0x7c   :  { %p2730_p1 = scmp.lt.u32.totalorder %s2726_s22, %s3098_s13 }
  0x7e   :  { %p2732_p2 = pnand %p2730_p1, %p2727_p0 }
  0x80   :  { %2735 = shalt.err (!%p2732_p2)
}
  0x81   :  { %s2736_s19 = scalar_lea.vmem %s126_s21, 1024  ;;  %p2741_p4 = scmp.lt.s32.totalorder %s126_s21, %s126_s21 }
  0x82   :  { %p2737_p3 = scmp.ne.s32.totalorder %s126_s21, %s2736_s19  ;;  %p2742_p5 = scmp.lt.s32.totalorder %s2736_s19, %s2736_s19 }
  0x84   :  { %p2743_p6 = por %p2742_p5, %p2741_p4 }
  0x86   :  { %p2744_p7 = pnand %p2743_p6, %p2737_p3 }
  0x88   :  { %2747 = shalt.err (!%p2744_p7)
}
  0x89   :  { %131 = dma.hbm_to_vmem [thread:$0]  %s3098_s13, 1024, %s126_s21, [#allocation15], %s2787_s5, %s2787_s5, %s2788_s18  }
  0x8a   :  { %2770 = dma.done.wait [#allocation3], 64  }
  0x8b   :  { %2771 = vsyncadd [#allocation3], 4294967232 }
  0x8c   :  { %2772 = dma.done.wait [#allocation6], 10240  }
  0x8d   :  { %2773 = vsyncadd [#allocation6], 4294957056 }
  0x8e   :  { %2774 = dma.done.wait [#allocation9], 12288  }
  0x8f   :  { %2775 = vsyncadd [#allocation9], 4294955008 }
  0x90   :  { %2776 = dma.done.wait [#allocation12], 3072  }
  0x91   :  { %2777 = vsyncadd [#allocation12], 4294964224 }
  0x92   :  { %2778 = dma.done.wait [#allocation15], 1024  }
  0x93   :  { %2779 = vsyncadd [#allocation15], 4294966272  ;;  %v2796_v0 = vmov 0   ;;  %v2276_v1 = vld [vmem:[#allocation5 + $0x4] ss:$8 sps:$4 sm:$0xff]   ;;  %vm2798_vm0 = vmmov 0  }
  0x94   :  { %300 = vmatprep.mubr.bf16.mxu0 %v2796_v0  ;;  %v2278_v2 = vld [vmem:[#allocation5] ss:$8 sps:$4 sm:$0xff]   ;;  %268 = vmatprep.subr.bf16.mxu0 %v2276_v1  ;;  %v2279_v3 = vld [vmem:[#allocation5 + $0x14] ss:$8 sps:$4 sm:$0xff]   ;;  %v2281_v4 = vld [vmem:[#allocation5 + $0x10] ss:$8 sps:$4 sm:$0xff]  }
  0x95   :  { %269 = vmatpush1.bf16.msra.mxu0 %v2278_v2  ;;  %v2282_v5 = vld [vmem:[#allocation5 + $0x24] ss:$8 sps:$4 sm:$0xff]   ;;  %v2284_v6 = vld [vmem:[#allocation5 + $0x20] ss:$8 sps:$4 sm:$0xff]   ;;  %v2285_v7 = vld [vmem:[#allocation5 + $0x34] ss:$8 sps:$4 sm:$0xff]  }
  0x96   :  { %270 = vmatprep.subr.bf16.mxu0 %v2279_v3  ;;  %v2287_v8 = vld [vmem:[#allocation5 + $0x30] ss:$8 sps:$4 sm:$0xff]   ;;  %v2300_v9 = vld [vmem:[#allocation7 + $0x4] ss:$16 sps:$4 sm:$0xff]   ;;  %v2290_v13 = vld [vmem:[#allocation5 + $0x40] ss:$8 sps:$4 sm:$0xff]  }
  0x97   :  { %v2288_v10 = vld [vmem:[#allocation5 + $0x44] ss:$8 sps:$4 sm:$0xff]   ;;  %719 = vmatprep.subr.bf16.mxu1 %v2300_v9  ;;  %v2305_v11 = vld [vmem:[#allocation7] ss:$16 sps:$4 sm:$0xff]   ;;  %v2291_v14 = vld [vmem:[#allocation5 + $0x54] ss:$8 sps:$4 sm:$0xff]  }
  0x98   :  { %v2306_v12 = vld [vmem:[#allocation7 + $0x24] ss:$16 sps:$4 sm:$0xff]   ;;  %720 = vmatpush1.bf16.msra.mxu1 %v2305_v11  ;;  %v2311_v15 = vld [vmem:[#allocation7 + $0x20] ss:$16 sps:$4 sm:$0xff]   ;;  %v2304_v26 = vld [vmem:[#allocation7 + $0xc] ss:$16 sps:$4 sm:$0xff]  }
  0x99   :  { %271 = vmatpush1.bf16.msra.mxu0 %v2281_v4  ;;  %721 = vmatprep.subr.bf16.mxu1 %v2306_v12  ;;  %v2312_v16 = vld [vmem:[#allocation7 + $0x44] ss:$16 sps:$4 sm:$0xff]   ;;  %v2293_v17 = vld [vmem:[#allocation5 + $0x50] ss:$8 sps:$4 sm:$0xff]   ;;  %v2296_v21 = vld [vmem:[#allocation5 + $0x60] ss:$8 sps:$4 sm:$0xff]  }
  0x9a   :  { %272 = vmatprep.subr.bf16.mxu0 %v2282_v5  ;;  %v2294_v18 = vld [vmem:[#allocation5 + $0x64] ss:$8 sps:$4 sm:$0xff]   ;;  %v2317_v19 = vld [vmem:[#allocation7 + $0x40] ss:$16 sps:$4 sm:$0xff]   ;;  %v2297_v22 = vld [vmem:[#allocation5 + $0x74] ss:$8 sps:$4 sm:$0xff]  }
  0x9b   :  { %v2318_v20 = vld [vmem:[#allocation7 + $0x64] ss:$16 sps:$4 sm:$0xff]   ;;  %v2323_v23 = vld [vmem:[#allocation7 + $0x60] ss:$16 sps:$4 sm:$0xff]   ;;  %v159_v29 = vld [vmem:[#allocation2] sm:$0xf] }
  0x9c   :  { %722 = vmatpush1.bf16.msra.mxu1 %v2311_v15  ;;  %v2324_v24 = vld [vmem:[#allocation7 + $0x84] ss:$16 sps:$4 sm:$0xff]   ;;  %v2299_v25 = vld [vmem:[#allocation5 + $0x70] ss:$8 sps:$4 sm:$0xff]   ;;  %v2310_v31 = vld [vmem:[#allocation7 + $0x2c] ss:$16 sps:$4 sm:$0xff]  }
  0x9d   :  { %273 = vmatpush1.bf16.msra.mxu0 %v2284_v6  ;;  %723 = vmatprep.subr.bf16.mxu1 %v2312_v16  ;;  %v2329_v27 = vld [vmem:[#allocation7 + $0x80] ss:$16 sps:$4 sm:$0xff]   ;;  %v2330_v28 = vld [vmem:[#allocation7 + $0xa4] ss:$16 sps:$4 sm:$0xff]   ;;  %v2302_v30 = vld [vmem:[#allocation7 + $0x8] ss:$16 sps:$4 sm:$0xff]  }
  0x9e   :  { %274 = vmatprep.subr.bf16.mxu0 %v2285_v7  ;;  %v2335_v32 = vld [vmem:[#allocation7 + $0xa0] ss:$16 sps:$4 sm:$0xff]   ;;  %v2336_v33 = vld [vmem:[#allocation7 + $0xc4] ss:$16 sps:$4 sm:$0xff]   ;;  %v2308_v34 = vld [vmem:[#allocation7 + $0x28] ss:$16 sps:$4 sm:$0xff]  }
  0x9f   :  { %v2316_v35 = vld [vmem:[#allocation7 + $0x4c] ss:$16 sps:$4 sm:$0xff]   ;;  %v2341_v36 = vld [vmem:[#allocation7 + $0xc0] ss:$16 sps:$4 sm:$0xff]   ;;  %v2342_v37 = vld [vmem:[#allocation7 + $0xe4] ss:$16 sps:$4 sm:$0xff]  }
  0xa0   :  { %724 = vmatpush1.bf16.msra.mxu1 %v2317_v19  ;;  %v2314_v38 = vld [vmem:[#allocation7 + $0x48] ss:$16 sps:$4 sm:$0xff]   ;;  %v2322_v39 = vld [vmem:[#allocation7 + $0x6c] ss:$16 sps:$4 sm:$0xff]   ;;  %v2347_v40 = vld [vmem:[#allocation7 + $0xe0] ss:$16 sps:$4 sm:$0xff]  }
  0xa1   :  { %275 = vmatpush1.bf16.msra.mxu0 %v2287_v8  ;;  %725 = vmatprep.subr.bf16.mxu1 %v2318_v20  ;;  %v2348_v41 = vld [vmem:[#allocation7 + $0x104] ss:$16 sps:$4 sm:$0xff]   ;;  %v2320_v42 = vld [vmem:[#allocation7 + $0x68] ss:$16 sps:$4 sm:$0xff]   ;;  %v2328_v43 = vld [vmem:[#allocation7 + $0x8c] ss:$16 sps:$4 sm:$0xff]   ;;  %v178_v20 = vlaneseq }
  0xa2   :  { %276 = vmatprep.subr.bf16.mxu0 %v2288_v10  ;;  %v2353_v44 = vld [vmem:[#allocation7 + $0x100] ss:$16 sps:$4 sm:$0xff]   ;;  %v2354_v45 = vld [vmem:[#allocation7 + $0x124] ss:$16 sps:$4 sm:$0xff]   ;;  %v2326_v46 = vld [vmem:[#allocation7 + $0x88] ss:$16 sps:$4 sm:$0xff]  }
  0xa3   :  { %v2359_v47 = vld [vmem:[#allocation7 + $0x120] ss:$16 sps:$4 sm:$0xff]   ;;  %v2334_v48 = vld [vmem:[#allocation7 + $0xac] ss:$16 sps:$4 sm:$0xff]   ;;  %v2360_v49 = vld [vmem:[#allocation7 + $0x144] ss:$16 sps:$4 sm:$0xff]  }
  0xa4   :  { %726 = vmatpush1.bf16.msra.mxu1 %v2323_v23  ;;  %v2332_v50 = vld [vmem:[#allocation7 + $0xa8] ss:$16 sps:$4 sm:$0xff]   ;;  %v2365_v51 = vld [vmem:[#allocation7 + $0x140] ss:$16 sps:$4 sm:$0xff]   ;;  %v2340_v52 = vld [vmem:[#allocation7 + $0xcc] ss:$16 sps:$4 sm:$0xff]  }
  0xa5   :  { %277 = vmatpush1.bf16.msra.mxu0 %v2290_v13  ;;  %727 = vmatprep.subr.bf16.mxu1 %v2324_v24  ;;  %v2366_v53 = vld [vmem:[#allocation7 + $0x164] ss:$16 sps:$4 sm:$0xff]   ;;  %v2338_v54 = vld [vmem:[#allocation7 + $0xc8] ss:$16 sps:$4 sm:$0xff]   ;;  %v2371_v55 = vld [vmem:[#allocation7 + $0x160] ss:$16 sps:$4 sm:$0xff]  }
  0xa6   :  { %278 = vmatprep.subr.bf16.mxu0 %v2291_v14  ;;  %v2346_v56 = vld [vmem:[#allocation7 + $0xec] ss:$16 sps:$4 sm:$0xff]   ;;  %v2372_v57 = vld [vmem:[#allocation7 + $0x184] ss:$16 sps:$4 sm:$0xff]   ;;  %v2344_v58 = vld [vmem:[#allocation7 + $0xe8] ss:$16 sps:$4 sm:$0xff]  }
  0xa7   :  { %v2377_v59 = vld [vmem:[#allocation7 + $0x180] ss:$16 sps:$4 sm:$0xff]   ;;  %v2352_v60 = vld [vmem:[#allocation7 + $0x10c] ss:$16 sps:$4 sm:$0xff]   ;;  %v2378_v61 = vld [vmem:[#allocation7 + $0x1a4] ss:$16 sps:$4 sm:$0xff]  }
  0xa8   :  { %728 = vmatpush1.bf16.msra.mxu1 %v2329_v27  ;;  %v2350_v62 = vld [vmem:[#allocation7 + $0x108] ss:$16 sps:$4 sm:$0xff]   ;;  %v2383_v63 = vld [vmem:[#allocation7 + $0x1a0] ss:$16 sps:$4 sm:$0xff]   ;;  %v2358_v1 = vld [vmem:[#allocation7 + $0x12c] ss:$16 sps:$4 sm:$0xff]  }
  0xa9   :  { %279 = vmatpush1.bf16.msra.mxu0 %v2293_v17  ;;  %729 = vmatprep.subr.bf16.mxu1 %v2330_v28  ;;  %v2356_v2 = vld [vmem:[#allocation7 + $0x128] ss:$16 sps:$4 sm:$0xff]   ;;  %v2364_v3 = vld [vmem:[#allocation7 + $0x14c] ss:$16 sps:$4 sm:$0xff]   ;;  %v2384_v11 = vld [vmem:[#allocation7 + $0x1c4] ss:$16 sps:$4 sm:$0xff]  }
  0xaa   :  { %280 = vmatprep.subr.bf16.mxu0 %v2294_v18  ;;  %v2362_v4 = vld [vmem:[#allocation7 + $0x148] ss:$16 sps:$4 sm:$0xff]   ;;  %v2370_v5 = vld [vmem:[#allocation7 + $0x16c] ss:$16 sps:$4 sm:$0xff]   ;;  %v2389_v14 = vld [vmem:[#allocation7 + $0x1c0] ss:$16 sps:$4 sm:$0xff]  }
  0xab   :  { %v2368_v6 = vld [vmem:[#allocation7 + $0x168] ss:$16 sps:$4 sm:$0xff]   ;;  %v2376_v7 = vld [vmem:[#allocation7 + $0x18c] ss:$16 sps:$4 sm:$0xff]   ;;  %v2390_v15 = vld [vmem:[#allocation7 + $0x1e4] ss:$16 sps:$4 sm:$0xff]  }
  0xac   :  { %730 = vmatpush1.bf16.msra.mxu1 %v2335_v32  ;;  %v2374_v8 = vld [vmem:[#allocation7 + $0x188] ss:$16 sps:$4 sm:$0xff]   ;;  %v2382_v9 = vld [vmem:[#allocation7 + $0x1ac] ss:$16 sps:$4 sm:$0xff]   ;;  %v2395_v18 = vld [vmem:[#allocation7 + $0x1e0] ss:$16 sps:$4 sm:$0xff]  }
  0xad   :  { %281 = vmatpush1.bf16.msra.mxu0 %v2296_v21  ;;  %731 = vmatprep.subr.bf16.mxu1 %v2336_v33  ;;  %v2380_v10 = vld [vmem:[#allocation7 + $0x1a8] ss:$16 sps:$4 sm:$0xff]   ;;  %v2388_v12 = vld [vmem:[#allocation7 + $0x1cc] ss:$16 sps:$4 sm:$0xff]   ;;  %v2995_v21 = vshrl.u32 %v178_v20, 7  ;;  %s2799_s15 = smov [#allocation16]  }
  0xae   :  { %282 = vmatprep.subr.bf16.mxu0 %v2297_v22  ;;  %v2386_v13 = vld [vmem:[#allocation7 + $0x1c8] ss:$16 sps:$4 sm:$0xff]   ;;  %v2394_v16 = vld [vmem:[#allocation7 + $0x1ec] ss:$16 sps:$4 sm:$0xff]   ;;  %s1948_s7 = sshll.u32 %s2799_s15, 4  ;;  %s1949_s7 = int_to_ptr.vmem [resolvable:$true] %s1948_s7 }
  0xaf   :  { %v2392_v17 = vld [vmem:[#allocation7 + $0x1e8] ss:$16 sps:$4 sm:$0xff]   ;;  %v2398_v19 = vld [vmem:[#allocation8 + $0x4] ss:$8 sps:$4 sm:$0xff]   ;;  %v2998_v22 = vsub.s32 0, %v2995_v21  ;;  %v3004_v24 = vsub.s32 1, %v2995_v21  ;;  %p2753_p9 = scmp.lt.s32.totalorder %s1949_s7, %s1949_s7 }
  0xb0   :  { %732 = vmatpush1.bf16.msra.mxu1 %v2341_v36  ;;  %v176_v23 = vld [vmem:[%s3087_s2] sm:$0x3]  ;;  %v2396_v36 = vld [vmem:[#allocation8] ss:$8 sps:$4 sm:$0xff]  }
  0xb1   :  { %283 = vmatpush1.bf16.msra.mxu0 %v2299_v25  ;;  %733 = vmatprep.subr.bf16.mxu1 %v2342_v37  ;;  %v181_v25 = vrot.slane %v176_v23, %v2998_v22  ;;  %v2515_v20 = vld [vmem:[#allocation10 + $0x74] ss:$8 sps:$4 sm:$0xff]  }
  0xb2   :  { %760 = vmatprep.subr.bf16.mxu0 %v2304_v26  ;;  %v185_v26 = vrot.slane %v176_v23, %v3004_v24  ;;  %v2513_v23 = vld [vmem:[#allocation10 + $0x70] ss:$8 sps:$4 sm:$0xff]  }
  0xb4   :  { %301 = vmatmul.mubr.bf16.vlgmr.msra.gmra.mrb[0].mxu0 %v159_v29  ;;  %734 = vmatpush1.bf16.msra.mxu1 %v2347_v40  ;;  %v2404_v40 = vld [vmem:[#allocation8 + $0x24] ss:$8 sps:$4 sm:$0xff]  }
  0xb5   :  { %761 = vmatpush1.bf16.msra.mxu0 %v2302_v30  ;;  %735 = vmatprep.subr.bf16.mxu1 %v2348_v41  ;;  %v2402_v41 = vld [vmem:[#allocation8 + $0x20] ss:$8 sps:$4 sm:$0xff]  }
  0xb6   :  { %762 = vmatprep.subr.bf16.mxu0 %v2310_v31 }
  0xb8   :  { %736 = vmatpush1.bf16.msra.mxu1 %v2353_v44  ;;  %v2410_v44 = vld [vmem:[#allocation8 + $0x44] ss:$8 sps:$4 sm:$0xff]  }
  0xb9   :  { %763 = vmatpush1.bf16.msra.mxu0 %v2308_v34  ;;  %737 = vmatprep.subr.bf16.mxu1 %v2354_v45  ;;  %v2408_v45 = vld [vmem:[#allocation8 + $0x40] ss:$8 sps:$4 sm:$0xff]  }
  0xba   :  { %764 = vmatprep.subr.bf16.mxu0 %v2316_v35 }
  0xbc   :  { %738 = vmatpush1.bf16.msra.mxu1 %v2359_v47  ;;  %v2411_v47 = vld [vmem:[#allocation8 + $0x50] ss:$8 sps:$4 sm:$0xff]  }
  0xbd   :  { %765 = vmatpush1.bf16.msra.mxu0 %v2314_v38  ;;  %739 = vmatprep.subr.bf16.mxu1 %v2360_v49  ;;  %v2401_v38 = vld [vmem:[#allocation8 + $0x14] ss:$8 sps:$4 sm:$0xff]   ;;  %v2414_v49 = vld [vmem:[#allocation8 + $0x60] ss:$8 sps:$4 sm:$0xff]  }
  0xbe   :  { %766 = vmatprep.subr.bf16.mxu0 %v2322_v39  ;;  %v2399_v39 = vld [vmem:[#allocation8 + $0x10] ss:$8 sps:$4 sm:$0xff]  }
  0xc0   :  { %740 = vmatpush1.bf16.msra.mxu1 %v2365_v51  ;;  %v2417_v51 = vld [vmem:[#allocation8 + $0x70] ss:$8 sps:$4 sm:$0xff]  }
  0xc1   :  { %767 = vmatpush1.bf16.msra.mxu0 %v2320_v42  ;;  %741 = vmatprep.subr.bf16.mxu1 %v2366_v53  ;;  %v2407_v42 = vld [vmem:[#allocation8 + $0x34] ss:$8 sps:$4 sm:$0xff]   ;;  %v2420_v53 = vld [vmem:[#allocation8 + $0x80] ss:$8 sps:$4 sm:$0xff]  }
  0xc2   :  { %768 = vmatprep.subr.bf16.mxu0 %v2328_v43  ;;  %v2405_v43 = vld [vmem:[#allocation8 + $0x30] ss:$8 sps:$4 sm:$0xff]  }
  0xc4   :  { %742 = vmatpush1.bf16.msra.mxu1 %v2371_v55  ;;  %v2423_v55 = vld [vmem:[#allocation8 + $0x90] ss:$8 sps:$4 sm:$0xff]  }
  0xc5   :  { %769 = vmatpush1.bf16.msra.mxu0 %v2326_v46  ;;  %743 = vmatprep.subr.bf16.mxu1 %v2372_v57  ;;  %v2413_v46 = vld [vmem:[#allocation8 + $0x54] ss:$8 sps:$4 sm:$0xff]   ;;  %v2426_v57 = vld [vmem:[#allocation8 + $0xa0] ss:$8 sps:$4 sm:$0xff]  }
  0xc6   :  { %770 = vmatprep.subr.bf16.mxu0 %v2334_v48  ;;  %v2416_v48 = vld [vmem:[#allocation8 + $0x64] ss:$8 sps:$4 sm:$0xff]  }
  0xc8   :  { %744 = vmatpush1.bf16.msra.mxu1 %v2377_v59  ;;  %v2429_v59 = vld [vmem:[#allocation8 + $0xb0] ss:$8 sps:$4 sm:$0xff]  }
  0xc9   :  { %771 = vmatpush1.bf16.msra.mxu0 %v2332_v50  ;;  %745 = vmatprep.subr.bf16.mxu1 %v2378_v61  ;;  %v2419_v50 = vld [vmem:[#allocation8 + $0x74] ss:$8 sps:$4 sm:$0xff]   ;;  %v2432_v61 = vld [vmem:[#allocation8 + $0xc0] ss:$8 sps:$4 sm:$0xff]  }
  0xca   :  { %772 = vmatprep.subr.bf16.mxu0 %v2340_v52  ;;  %v2422_v52 = vld [vmem:[#allocation8 + $0x84] ss:$8 sps:$4 sm:$0xff]  }
  0xcc   :  { %746 = vmatpush1.bf16.msra.mxu1 %v2383_v63  ;;  %v2435_v63 = vld [vmem:[#allocation8 + $0xd0] ss:$8 sps:$4 sm:$0xff]  }
  0xcd   :  { %773 = vmatpush1.bf16.msra.mxu0 %v2338_v54  ;;  %747 = vmatprep.subr.bf16.mxu1 %v2384_v11  ;;  %v2425_v54 = vld [vmem:[#allocation8 + $0x94] ss:$8 sps:$4 sm:$0xff]   ;;  %v2498_v11 = vld [vmem:[#allocation10 + $0x20] ss:$8 sps:$4 sm:$0xff]  }
  0xce   :  { %774 = vmatprep.subr.bf16.mxu0 %v2346_v56  ;;  %v2428_v56 = vld [vmem:[#allocation8 + $0xa4] ss:$8 sps:$4 sm:$0xff]  }
  0xd0   :  { %748 = vmatpush1.bf16.msra.mxu1 %v2389_v14  ;;  %v2506_v14 = vld [vmem:[#allocation10 + $0x44] ss:$8 sps:$4 sm:$0xff]  }
  0xd1   :  { %775 = vmatpush1.bf16.msra.mxu0 %v2344_v58  ;;  %749 = vmatprep.subr.bf16.mxu1 %v2390_v15  ;;  %v2431_v58 = vld [vmem:[#allocation8 + $0xb4] ss:$8 sps:$4 sm:$0xff]   ;;  %v2504_v15 = vld [vmem:[#allocation10 + $0x40] ss:$8 sps:$4 sm:$0xff]  }
  0xd2   :  { %776 = vmatprep.subr.bf16.mxu0 %v2352_v60  ;;  %v2434_v60 = vld [vmem:[#allocation8 + $0xc4] ss:$8 sps:$4 sm:$0xff]  }
  0xd4   :  { %750 = vmatpush1.bf16.msra.mxu1 %v2395_v18  ;;  %v2512_v18 = vld [vmem:[#allocation10 + $0x64] ss:$8 sps:$4 sm:$0xff]  }
  0xd5   :  { %777 = vmatpush1.bf16.msra.mxu0 %v2350_v62  ;;  %1205 = vmatprep.subr.bf16.mxu1 %v2398_v19  ;;  %v2437_v62 = vld [vmem:[#allocation8 + $0xd4] ss:$8 sps:$4 sm:$0xff]   ;;  %v2510_v19 = vld [vmem:[#allocation10 + $0x60] ss:$8 sps:$4 sm:$0xff]  }
  0xd6   :  { %778 = vmatprep.subr.bf16.mxu0 %v2358_v1  ;;  %v2440_v1 = vld [vmem:[#allocation8 + $0xe4] ss:$8 sps:$4 sm:$0xff]  }
  0xd9   :  { %779 = vmatpush1.bf16.msra.mxu0 %v2356_v2  ;;  %v2438_v2 = vld [vmem:[#allocation8 + $0xe0] ss:$8 sps:$4 sm:$0xff]  }
  0xda   :  { %780 = vmatprep.subr.bf16.mxu0 %v2364_v3  ;;  %v2443_v3 = vld [vmem:[#allocation8 + $0xf4] ss:$8 sps:$4 sm:$0xff]  }
  0xdd   :  { %781 = vmatpush1.bf16.msra.mxu0 %v2362_v4  ;;  %v2441_v4 = vld [vmem:[#allocation8 + $0xf0] ss:$8 sps:$4 sm:$0xff]  }
  0xde   :  { %782 = vmatprep.subr.bf16.mxu0 %v2370_v5  ;;  %v2446_v5 = vld [vmem:[#allocation8 + $0x104] ss:$8 sps:$4 sm:$0xff]  }
  0xe1   :  { %783 = vmatpush1.bf16.msra.mxu0 %v2368_v6  ;;  %v2492_v6 = vld [vmem:[#allocation10] ss:$8 sps:$4 sm:$0xff]  }
  0xe2   :  { %784 = vmatprep.subr.bf16.mxu0 %v2376_v7  ;;  %v2494_v7 = vld [vmem:[#allocation10 + $0x4] ss:$8 sps:$4 sm:$0xff]  }
  0xe5   :  { %785 = vmatpush1.bf16.msra.mxu0 %v2374_v8  ;;  %v2497_v8 = vld [vmem:[#allocation10 + $0x14] ss:$8 sps:$4 sm:$0xff]  }
  0xe6   :  { %786 = vmatprep.subr.bf16.mxu0 %v2382_v9  ;;  %v2495_v9 = vld [vmem:[#allocation10 + $0x10] ss:$8 sps:$4 sm:$0xff]  }
  0xe9   :  { %787 = vmatpush1.bf16.msra.mxu0 %v2380_v10  ;;  %v2500_v10 = vld [vmem:[#allocation10 + $0x24] ss:$8 sps:$4 sm:$0xff]  }
  0xea   :  { %788 = vmatprep.subr.bf16.mxu0 %v2388_v12  ;;  %v2503_v12 = vld [vmem:[#allocation10 + $0x34] ss:$8 sps:$4 sm:$0xff]  }
  0xed   :  { %789 = vmatpush1.bf16.msra.mxu0 %v2386_v13  ;;  %v2501_v13 = vld [vmem:[#allocation10 + $0x30] ss:$8 sps:$4 sm:$0xff]  }
  0xee   :  { %790 = vmatprep.subr.bf16.mxu0 %v2394_v16  ;;  %v2509_v16 = vld [vmem:[#allocation10 + $0x54] ss:$8 sps:$4 sm:$0xff]  }
  0xf1   :  { %791 = vmatpush1.bf16.msra.mxu0 %v2392_v17  ;;  %v2507_v17 = vld [vmem:[#allocation10 + $0x50] ss:$8 sps:$4 sm:$0xff]  }
  0xf2   :  { %1495 = vmatprep.subr.bf16.mxu0 %v2494_v7  ;;  %v2464_v7 = vld [vmem:[#allocation8 + $0x164] ss:$8 sps:$4 sm:$0xff]  }
 0x187   :  { %v302_v27 = vpop.f32.mrb[0].mxu0 }
 0x188   :  { %v303_v28 = vadd.f32 %v302_v27, %v181_v25  ;;  %v304_v29 = vpop.f32.mrb[1].mxu0  ;;  %v2518_v25 = vld [vmem:[#allocation10 + $0x84] ss:$8 sps:$4 sm:$0xff]   ;;  %v2521_v27 = vld [vmem:[#allocation10 + $0x94] ss:$8 sps:$4 sm:$0xff]  }
 0x189   :  { %v305_v30 = vadd.f32 %v304_v29, %v185_v26  ;;  %v306_v31 = vpop.f32.mrb[2].mxu0  ;;  %v2516_v26 = vld [vmem:[#allocation10 + $0x80] ss:$8 sps:$4 sm:$0xff]   ;;  %v2524_v29 = vld [vmem:[#allocation10 + $0xa4] ss:$8 sps:$4 sm:$0xff]  }
 0x18a   :  { %v309_v32 = vpack.c.bf16 %v303_v28, %v303_v28  ;;  %v307_v33 = vpop.f32.mrb[3].mxu0  ;;  %v2519_v28 = vld [vmem:[#allocation10 + $0x90] ss:$8 sps:$4 sm:$0xff]   ;;  %v2527_v31 = vld [vmem:[#allocation10 + $0xb4] ss:$8 sps:$4 sm:$0xff]  }
 0x18b   :  { %v310_v34 = vpack.c.bf16 %v305_v30, %v305_v30  ;;  %v2522_v30 = vld [vmem:[#allocation10 + $0xa0] ss:$8 sps:$4 sm:$0xff]   ;;  %v2530_v33 = vld [vmem:[#allocation10 + $0xc4] ss:$8 sps:$4 sm:$0xff]  }
 0x18c   :  { %v311_v37 = vmax.bf16 %v2796_v0, %v309_v32  ;;  %v2525_v32 = vld [vmem:[#allocation10 + $0xb0] ss:$8 sps:$4 sm:$0xff]  }
 0x18d   :  { %v312_v35 = vmax.bf16 %v2796_v0, %v310_v34  ;;  %v2528_v34 = vld [vmem:[#allocation10 + $0xc0] ss:$8 sps:$4 sm:$0xff]  }
 0x18f   :  { %751 = vmatprep.mubr.bf16.mxu1 %v312_v35  ;;  %792 = vmatprep.mubr.bf16.mxu0 %v312_v35  ;;  %v2533_v35 = vld [vmem:[#allocation10 + $0xd4] ss:$8 sps:$4 sm:$0xff]  }
 0x190   :  { %752 = vmatmul.mubr.bf16.vlgmr.msra.gmra.mrb[0].mxu1 %v311_v37  ;;  %793 = vmatmul.mubr.bf16.vlgmr.msra.gmra.mrb[4].mxu0 %v311_v37  ;;  %v393_v37 = vsub.s32 3, %v2995_v21 }
 0x191   :  { %1206 = vmatpush1.bf16.msra.mxu1 %v2396_v36  ;;  %1496 = vmatpush1.bf16.msra.mxu0 %v2492_v6  ;;  %v3013_v36 = vld [vmem:[%s3089_s4] sm:$0xf]  ;;  %v2459_v6 = vld [vmem:[#allocation8 + $0x150] ss:$8 sps:$4 sm:$0xff]  }
 0x192   :  { %1207 = vmatprep.subr.bf16.mxu1 %v2401_v38  ;;  %1497 = vmatprep.subr.bf16.mxu0 %v2497_v8  ;;  %v2531_v38 = vld [vmem:[#allocation10 + $0xd0] ss:$8 sps:$4 sm:$0xff]   ;;  %v2462_v8 = vld [vmem:[#allocation8 + $0x160] ss:$8 sps:$4 sm:$0xff]  }
 0x195   :  { %1208 = vmatpush1.bf16.msra.mxu1 %v2399_v39  ;;  %1498 = vmatpush1.bf16.msra.mxu0 %v2495_v9  ;;  %v382_v39 = vrot.slane %v3013_v36, %v2998_v22  ;;  %v2467_v9 = vld [vmem:[#allocation8 + $0x174] ss:$8 sps:$4 sm:$0xff]  }
 0x196   :  { %1209 = vmatprep.subr.bf16.mxu1 %v2404_v40  ;;  %1499 = vmatprep.subr.bf16.mxu0 %v2500_v10  ;;  %v386_v40 = vrot.slane %v3013_v36, %v3004_v24  ;;  %v2465_v10 = vld [vmem:[#allocation8 + $0x170] ss:$8 sps:$4 sm:$0xff]  }
 0x199   :  { %1210 = vmatpush1.bf16.msra.mxu1 %v2402_v41  ;;  %1500 = vmatpush1.bf16.msra.mxu0 %v2498_v11  ;;  %v394_v41 = vrot.slane %v3013_v36, %v393_v37  ;;  %v2470_v11 = vld [vmem:[#allocation8 + $0x184] ss:$8 sps:$4 sm:$0xff]   ;;  %v2537_v37 = vld [vmem:[#allocation10 + $0xf0] ss:$8 sps:$4 sm:$0xff]  }
 0x19a   :  { %1211 = vmatprep.subr.bf16.mxu1 %v2407_v42  ;;  %1501 = vmatprep.subr.bf16.mxu0 %v2503_v12  ;;  %v2468_v12 = vld [vmem:[#allocation8 + $0x180] ss:$8 sps:$4 sm:$0xff]  }
 0x19d   :  { %1212 = vmatpush1.bf16.msra.mxu1 %v2405_v43  ;;  %1502 = vmatpush1.bf16.msra.mxu0 %v2501_v13  ;;  %v2473_v13 = vld [vmem:[#allocation8 + $0x194] ss:$8 sps:$4 sm:$0xff]  }
 0x19e   :  { %1213 = vmatprep.subr.bf16.mxu1 %v2410_v44  ;;  %1503 = vmatprep.subr.bf16.mxu0 %v2506_v14  ;;  %v2471_v14 = vld [vmem:[#allocation8 + $0x190] ss:$8 sps:$4 sm:$0xff]  }
 0x1a1   :  { %1214 = vmatpush1.bf16.msra.mxu1 %v2408_v45  ;;  %1504 = vmatpush1.bf16.msra.mxu0 %v2504_v15  ;;  %v2476_v15 = vld [vmem:[#allocation8 + $0x1a4] ss:$8 sps:$4 sm:$0xff]  }
 0x1a2   :  { %1215 = vmatprep.subr.bf16.mxu1 %v2413_v46  ;;  %1505 = vmatprep.subr.bf16.mxu0 %v2509_v16  ;;  %v2474_v16 = vld [vmem:[#allocation8 + $0x1a0] ss:$8 sps:$4 sm:$0xff]  }
 0x1a5   :  { %1216 = vmatpush1.bf16.msra.mxu1 %v2411_v47  ;;  %1506 = vmatpush1.bf16.msra.mxu0 %v2507_v17  ;;  %v2479_v17 = vld [vmem:[#allocation8 + $0x1b4] ss:$8 sps:$4 sm:$0xff]  }
 0x1a6   :  { %1217 = vmatprep.subr.bf16.mxu1 %v2416_v48  ;;  %1507 = vmatprep.subr.bf16.mxu0 %v2512_v18  ;;  %v2477_v18 = vld [vmem:[#allocation8 + $0x1b0] ss:$8 sps:$4 sm:$0xff]  }
 0x1a9   :  { %1218 = vmatpush1.bf16.msra.mxu1 %v2414_v49  ;;  %1508 = vmatpush1.bf16.msra.mxu0 %v2510_v19  ;;  %v2482_v19 = vld [vmem:[#allocation8 + $0x1c4] ss:$8 sps:$4 sm:$0xff]  }
 0x1aa   :  { %1219 = vmatprep.subr.bf16.mxu1 %v2419_v50  ;;  %1509 = vmatprep.subr.bf16.mxu0 %v2515_v20  ;;  %v2480_v20 = vld [vmem:[#allocation8 + $0x1c0] ss:$8 sps:$4 sm:$0xff]  }
 0x1ad   :  { %1220 = vmatpush1.bf16.msra.mxu1 %v2417_v51  ;;  %1510 = vmatpush1.bf16.msra.mxu0 %v2513_v23  ;;  %v389_v23 = vsub.s32 2, %v2995_v21 }
 0x1ae   :  { %1221 = vmatprep.subr.bf16.mxu1 %v2422_v52  ;;  %1511 = vmatprep.subr.bf16.mxu0 %v2518_v25  ;;  %v2485_v25 = vld [vmem:[#allocation8 + $0x1d4] ss:$8 sps:$4 sm:$0xff]  }
 0x1b1   :  { %1222 = vmatpush1.bf16.msra.mxu1 %v2420_v53  ;;  %1512 = vmatpush1.bf16.msra.mxu0 %v2516_v26  ;;  %v2483_v26 = vld [vmem:[#allocation8 + $0x1d0] ss:$8 sps:$4 sm:$0xff]  }
 0x1b2   :  { %1223 = vmatprep.subr.bf16.mxu1 %v2425_v54  ;;  %1513 = vmatprep.subr.bf16.mxu0 %v2521_v27  ;;  %v390_v27 = vrot.slane %v3013_v36, %v389_v23  ;;  %v2539_v36 = vld [vmem:[#allocation10 + $0xf4] ss:$8 sps:$4 sm:$0xff]   ;;  %v2561_v23 = vld [vmem:[#allocation13 + $0x28] sm:$0xff]  }
 0x1b5   :  { %1224 = vmatpush1.bf16.msra.mxu1 %v2423_v55  ;;  %1514 = vmatpush1.bf16.msra.mxu0 %v2519_v28  ;;  %v2488_v28 = vld [vmem:[#allocation8 + $0x1e4] ss:$8 sps:$4 sm:$0xff]  }
 0x1b6   :  { %1225 = vmatprep.subr.bf16.mxu1 %v2428_v56  ;;  %1515 = vmatprep.subr.bf16.mxu0 %v2524_v29  ;;  %v2486_v29 = vld [vmem:[#allocation8 + $0x1e0] ss:$8 sps:$4 sm:$0xff]  }
 0x1b9   :  { %1226 = vmatpush1.bf16.msra.mxu1 %v2426_v57  ;;  %1516 = vmatpush1.bf16.msra.mxu0 %v2522_v30  ;;  %v2444_v57 = vld [vmem:[#allocation8 + $0x100] ss:$8 sps:$4 sm:$0xff]  }
 0x1ba   :  { %1227 = vmatprep.subr.bf16.mxu1 %v2431_v58  ;;  %1517 = vmatprep.subr.bf16.mxu0 %v2527_v31  ;;  %v2491_v31 = vld [vmem:[#allocation8 + $0x1f4] ss:$8 sps:$4 sm:$0xff]  }
 0x1bd   :  { %1228 = vmatpush1.bf16.msra.mxu1 %v2429_v59  ;;  %1518 = vmatpush1.bf16.msra.mxu0 %v2525_v32  ;;  %v2449_v59 = vld [vmem:[#allocation8 + $0x114] ss:$8 sps:$4 sm:$0xff]   ;;  %v2489_v32 = vld [vmem:[#allocation8 + $0x1f0] ss:$8 sps:$4 sm:$0xff]  }
 0x1be   :  { %1229 = vmatprep.subr.bf16.mxu1 %v2434_v60  ;;  %1519 = vmatprep.subr.bf16.mxu0 %v2530_v33 }
 0x1c1   :  { %1230 = vmatpush1.bf16.msra.mxu1 %v2432_v61  ;;  %1520 = vmatpush1.bf16.msra.mxu0 %v2528_v34  ;;  %v2447_v61 = vld [vmem:[#allocation8 + $0x110] ss:$8 sps:$4 sm:$0xff]   ;;  %v2536_v34 = vld [vmem:[#allocation10 + $0xe4] ss:$8 sps:$4 sm:$0xff]  }
 0x1c2   :  { %1231 = vmatprep.subr.bf16.mxu1 %v2437_v62  ;;  %1521 = vmatprep.subr.bf16.mxu0 %v2533_v35  ;;  %v2452_v62 = vld [vmem:[#allocation8 + $0x124] ss:$8 sps:$4 sm:$0xff]   ;;  %v2534_v35 = vld [vmem:[#allocation10 + $0xe0] ss:$8 sps:$4 sm:$0xff]  }
 0x1c5   :  { %1232 = vmatpush1.bf16.msra.mxu1 %v2435_v63  ;;  %1522 = vmatpush1.bf16.msra.mxu0 %v2531_v38  ;;  %v2450_v63 = vld [vmem:[#allocation8 + $0x120] ss:$8 sps:$4 sm:$0xff]  }
 0x1c6   :  { %1233 = vmatprep.subr.bf16.mxu1 %v2440_v1  ;;  %v2455_v1 = vld [vmem:[#allocation8 + $0x134] ss:$8 sps:$4 sm:$0xff]   ;;  %1523 = vmatprep.subr.bf16.mxu0 %v2536_v34  ;;  %v2540_v38 = vld [vmem:[#allocation11 + $0x40] sm:$0xff]  }
 0x1c9   :  { %1234 = vmatpush1.bf16.msra.mxu1 %v2438_v2  ;;  %v2453_v2 = vld [vmem:[#allocation8 + $0x130] ss:$8 sps:$4 sm:$0xff]   ;;  %1524 = vmatpush1.bf16.msra.mxu0 %v2534_v35 }
 0x1ca   :  { %1235 = vmatprep.subr.bf16.mxu1 %v2443_v3  ;;  %v2458_v3 = vld [vmem:[#allocation8 + $0x144] ss:$8 sps:$4 sm:$0xff]   ;;  %1525 = vmatprep.subr.bf16.mxu0 %v2539_v36 }
 0x1cd   :  { %1236 = vmatpush1.bf16.msra.mxu1 %v2441_v4  ;;  %v2456_v4 = vld [vmem:[#allocation8 + $0x140] ss:$8 sps:$4 sm:$0xff]   ;;  %1526 = vmatpush1.bf16.msra.mxu0 %v2537_v37 }
 0x1ce   :  { %1246 = vmatprep.subr.bf16.mxu1 %v2446_v5  ;;  %v2461_v5 = vld [vmem:[#allocation8 + $0x154] ss:$8 sps:$4 sm:$0xff]   ;;  %2172 = vmatprep.subr.bf16.mxu0 %v2540_v38 }
 0x263   :  { %v753_v42 = vpop.f32.mrb[0].mxu1  ;;  %v3021_v43 = vpop.f32.mrb[4].mxu0 }
 0x264   :  { %v754_v44 = vadd.f32 %v753_v42, %v382_v39  ;;  %v755_v45 = vpop.f32.mrb[1].mxu1  ;;  %v796_v46 = vpop.f32.mrb[5].mxu0  ;;  %v795_v30 = vadd.f32 %v3021_v43, %v390_v27  ;;  %v873_v39 = vld [vmem:[%s3091_s6] sm:$0x3]  ;;  %v2564_v27 = vld [vmem:[#allocation14] sm:$0xff]  }
 0x265   :  { %v756_v47 = vadd.f32 %v755_v45, %v386_v40  ;;  %v797_v48 = vadd.f32 %v796_v46, %v394_v41  ;;  %v757_v49 = vpop.f32.mrb[2].mxu1  ;;  %v798_v50 = vpop.f32.mrb[6].mxu0  ;;  %v878_v40 = vrot.slane %v873_v39, %v2998_v22  ;;  %v882_v41 = vrot.slane %v873_v39, %v3004_v24 }
 0x266   :  { %v801_v51 = vpack.c.bf16 %v754_v44, %v754_v44  ;;  %v758_v52 = vpop.f32.mrb[3].mxu1  ;;  %v799_v53 = vpop.f32.mrb[7].mxu0  ;;  %v803_v33 = vpack.c.bf16 %v795_v30, %v795_v30  ;;  %v2567_v30 = vld [vmem:[#allocation14 + $0x18] sm:$0xff]  }
 0x267   :  { %v802_v54 = vpack.c.bf16 %v756_v47, %v756_v47  ;;  %v804_v55 = vpack.c.bf16 %v797_v48, %v797_v48  ;;  %v2542_v53 = vld [vmem:[#allocation11 + $0x48] sm:$0xff]  }
 0x268   :  { %v805_v58 = vmax.bf16 %v2796_v0, %v801_v51  ;;  %v807_v21 = vmax.bf16 %v2796_v0, %v803_v33  ;;  %v2541_v51 = vld [vmem:[#allocation11] sm:$0xff]  }
 0x269   :  { %v806_v56 = vmax.bf16 %v2796_v0, %v802_v54  ;;  %v808_v60 = vmax.bf16 %v2796_v0, %v804_v55  ;;  %v2543_v54 = vld [vmem:[#allocation11 + $0x8] sm:$0xff]   ;;  %v2544_v55 = vld [vmem:[#allocation11 + $0x50] sm:$0xff]  }
 0x26b   :  { %1237 = vmatprep.mubr.bf16.mxu1 %v806_v56  ;;  %v2545_v56 = vld [vmem:[#allocation11 + $0x10] sm:$0xff]  }
 0x26c   :  { %1238 = vmatmul.mubr.bf16.vlgmr.msra.gmra.mrb[4].mxu1 %v805_v58  ;;  %v2547_v58 = vld [vmem:[#allocation11 + $0x18] sm:$0xff]  }
 0x26d   :  { %1247 = vmatpush1.bf16.msra.mxu1 %v2444_v57  ;;  %1278 = vmatprep.mubr.bf16.mxu1 %v808_v60  ;;  %v2546_v57 = vld [vmem:[#allocation11 + $0x58] sm:$0xff]   ;;  %v2549_v60 = vld [vmem:[#allocation11 + $0x20] sm:$0xff]  }
 0x26e   :  { %1248 = vmatprep.subr.bf16.mxu1 %v2449_v59  ;;  %v2548_v59 = vld [vmem:[#allocation11 + $0x60] sm:$0xff]  }
 0x271   :  { %1249 = vmatpush1.bf16.msra.mxu1 %v2447_v61  ;;  %v2550_v61 = vld [vmem:[#allocation11 + $0x68] sm:$0xff]  }
 0x272   :  { %1250 = vmatprep.subr.bf16.mxu1 %v2452_v62  ;;  %v2551_v62 = vld [vmem:[#allocation11 + $0x28] sm:$0xff]  }
 0x275   :  { %1251 = vmatpush1.bf16.msra.mxu1 %v2450_v63  ;;  %v2552_v63 = vld [vmem:[#allocation11 + $0x70] sm:$0xff]  }
 0x276   :  { %1252 = vmatprep.subr.bf16.mxu1 %v2455_v1  ;;  %v2553_v1 = vld [vmem:[#allocation11 + $0x30] sm:$0xff]  }
 0x279   :  { %1253 = vmatpush1.bf16.msra.mxu1 %v2453_v2  ;;  %v2554_v2 = vld [vmem:[#allocation11 + $0x78] sm:$0xff]  }
 0x27a   :  { %1254 = vmatprep.subr.bf16.mxu1 %v2458_v3  ;;  %v2555_v3 = vld [vmem:[#allocation11 + $0x38] sm:$0xff]  }
 0x27d   :  { %1255 = vmatpush1.bf16.msra.mxu1 %v2456_v4  ;;  %v2797_v4 = vmov 0.0  }
 0x27e   :  { %1256 = vmatprep.subr.bf16.mxu1 %v2461_v5  ;;  %v1323_v5 = vld [vmem:[%s3093_s8] sm:$0x3] }
 0x281   :  { %1257 = vmatpush1.bf16.msra.mxu1 %v2459_v6  ;;  %v1328_v6 = vrot.slane %v1323_v5, %v2998_v22  ;;  %v2558_v22 = vld [vmem:[#allocation13 + $0x10] sm:$0xff]  }
 0x282   :  { %1258 = vmatprep.subr.bf16.mxu1 %v2464_v7  ;;  %v1332_v7 = vrot.slane %v1323_v5, %v3004_v24  ;;  %v2559_v24 = vld [vmem:[#allocation13 + $0x18] sm:$0xff]  }
 0x285   :  { %1259 = vmatpush1.bf16.msra.mxu1 %v2462_v8 }
 0x286   :  { %1260 = vmatprep.subr.bf16.mxu1 %v2467_v9 }
 0x289   :  { %1261 = vmatpush1.bf16.msra.mxu1 %v2465_v10 }
 0x28a   :  { %1262 = vmatprep.subr.bf16.mxu1 %v2470_v11 }
 0x28d   :  { %1263 = vmatpush1.bf16.msra.mxu1 %v2468_v12 }
 0x28e   :  { %1264 = vmatprep.subr.bf16.mxu1 %v2473_v13 }
 0x291   :  { %1265 = vmatpush1.bf16.msra.mxu1 %v2471_v14 }
 0x292   :  { %1266 = vmatprep.subr.bf16.mxu1 %v2476_v15 }
 0x295   :  { %1267 = vmatpush1.bf16.msra.mxu1 %v2474_v16 }
 0x296   :  { %1268 = vmatprep.subr.bf16.mxu1 %v2479_v17  ;;  %v2556_v17 = vld [vmem:[#allocation13] sm:$0xff]  }
 0x299   :  { %1269 = vmatpush1.bf16.msra.mxu1 %v2477_v18 }
 0x29a   :  { %1270 = vmatprep.subr.bf16.mxu1 %v2482_v19  ;;  %v2557_v19 = vld [vmem:[#allocation13 + $0x8] sm:$0xff]  }
 0x29d   :  { %1271 = vmatpush1.bf16.msra.mxu1 %v2480_v20  ;;  %v2560_v20 = vld [vmem:[#allocation13 + $0x20] sm:$0xff]  }
 0x29e   :  { %1272 = vmatprep.subr.bf16.mxu1 %v2485_v25  ;;  %v2562_v25 = vld [vmem:[#allocation13 + $0x30] sm:$0xff]  }
 0x2a1   :  { %1273 = vmatpush1.bf16.msra.mxu1 %v2483_v26  ;;  %v2563_v26 = vld [vmem:[#allocation13 + $0x38] sm:$0xff]  }
 0x2a2   :  { %1274 = vmatprep.subr.bf16.mxu1 %v2488_v28  ;;  %v2565_v28 = vld [vmem:[#allocation14 + $0x8] sm:$0xff]  }
 0x2a5   :  { %1275 = vmatpush1.bf16.msra.mxu1 %v2486_v29  ;;  %v2566_v29 = vld [vmem:[#allocation14 + $0x10] sm:$0xff]  }
 0x2a6   :  { %1276 = vmatprep.subr.bf16.mxu1 %v2491_v31  ;;  %v2568_v31 = vld [vmem:[#allocation14 + $0x20] sm:$0xff]  }
 0x2a9   :  { %1277 = vmatpush1.bf16.msra.mxu1 %v2489_v32  ;;  %v2569_v32 = vld [vmem:[#allocation14 + $0x28] sm:$0xff]  }
 0x2aa   :  { %2232 = vmatprep.subr.bf16.mxu1 %v2797_v4 }
 0x2ac   :  { %1279 = vmatmul.mubr.bf16.vlgmr.msra.gmra.mrb[4].mxu1 %v807_v21  ;;  %v2137_v21 = vld [vmem:[%s3095_s10] ss:$0 sm:$0xff] }
 0x2ad   :  { %2248 = vmatprep.mubr.msk.bf16.mxu1 %vm2798_vm0, %v2797_v4  ;;  %2233 = vmatpush3.bf16.msra.mxu1 %v2564_v27 }
 0x2ae   :  { %2234 = vmatprep.subr.bf16.mxu1 %v2797_v4 }
 0x2b1   :  { %2235 = vmatpush3.bf16.msra.mxu1 %v2565_v28 }
 0x2b2   :  { %2236 = vmatprep.subr.bf16.mxu1 %v2797_v4 }
 0x2b5   :  { %2237 = vmatpush3.bf16.msra.mxu1 %v2566_v29 }
 0x2b6   :  { %2238 = vmatprep.subr.bf16.mxu1 %v2797_v4 }
 0x2b9   :  { %2239 = vmatpush3.bf16.msra.mxu1 %v2567_v30 }
 0x2ba   :  { %2240 = vmatprep.subr.bf16.mxu1 %v2797_v4 }
 0x2bd   :  { %2241 = vmatpush3.bf16.msra.mxu1 %v2568_v31 }
 0x2be   :  { %2242 = vmatprep.subr.bf16.mxu1 %v2797_v4 }
 0x2c1   :  { %2243 = vmatpush3.bf16.msra.mxu1 %v2569_v32 }
 0x2c2   :  { %2244 = vmatprep.subr.bf16.mxu1 %v2797_v4 }
 0x37f   :  { %v1280_v42 = vpop.f32.mrb[4].mxu1 }
 0x380   :  { %v2252_v43 = vadd.f32 %v1280_v42, %v878_v40  ;;  %v1282_v44 = vpop.f32.mrb[5].mxu1  ;;  %v2571_v42 = vld [vmem:[#allocation14 + $0x38] sm:$0xff]  }
 0x381   :  { %v2253_v45 = vadd.f32 %v1282_v44, %v882_v41  ;;  %v1284_v46 = vpop.f32.mrb[6].mxu1  ;;  %v2570_v41 = vld [vmem:[#allocation14 + $0x30] sm:$0xff]  }
 0x382   :  { %v1287_v47 = vpack.c.bf16 %v2252_v43, %v2252_v43  ;;  %v1285_v48 = vpop.f32.mrb[7].mxu1  ;;  %2245 = vmatpush3.bf16.msra.mxu1 %v2570_v41  ;;  %v2154_v43 = vld [vmem:[%s3097_s12] ss:$0 sm:$0xff]  ;;  %s2748_s12 = scalar_lea.vmem %s1949_s7, 128 }
 0x383   :  { %v1288_v49 = vpack.c.bf16 %v2253_v45, %v2253_v45  ;;  %2246 = vmatprep.subr.bf16.mxu1 %v2797_v4  ;;  %p2749_p8 = scmp.ne.s32.totalorder %s1949_s7, %s2748_s12  ;;  %p2754_p10 = scmp.lt.s32.totalorder %s2748_s12, %s2748_s12 }
 0x384   :  { %v1289_v52 = vmax.bf16 %v2796_v0, %v1287_v47 }
 0x385   :  { %v1290_v50 = vmax.bf16 %v2796_v0, %v1288_v49  ;;  %p2755_p11 = por %p2754_p10, %p2753_p9 }
 0x386   :  { %2247 = vmatpush3.bf16.msra.mxu1 %v2571_v42 }
 0x387   :  { %1527 = vmatprep.mubr.bf16.mxu0 %v1290_v50  ;;  %p2756_p12 = pnand %p2755_p11, %p2749_p8 }
 0x388   :  { %1528 = vmatmul.mubr.bf16.vlgmr.msra.gmra.mrb[8].mxu0 %v1289_v52 }
 0x389   :  { %2173 = vmatpush3.bf16.msra.mxu0 %v2541_v51  ;;  %v2163_v51 = vld [vmem:[%s3099_s14] ss:$0 sm:$0xff] }
 0x38a   :  { %2174 = vmatprep.subr.bf16.mxu0 %v2542_v53 }
 0x38d   :  { %2175 = vmatpush3.bf16.msra.mxu0 %v2543_v54 }
 0x38e   :  { %2176 = vmatprep.subr.bf16.mxu0 %v2544_v55 }
 0x391   :  { %2177 = vmatpush3.bf16.msra.mxu0 %v2545_v56 }
 0x392   :  { %2178 = vmatprep.subr.bf16.mxu0 %v2546_v57 }
 0x395   :  { %2179 = vmatpush3.bf16.msra.mxu0 %v2547_v58 }
 0x396   :  { %2180 = vmatprep.subr.bf16.mxu0 %v2548_v59 }
 0x399   :  { %2181 = vmatpush3.bf16.msra.mxu0 %v2549_v60 }
 0x39a   :  { %2182 = vmatprep.subr.bf16.mxu0 %v2550_v61 }
 0x39d   :  { %2183 = vmatpush3.bf16.msra.mxu0 %v2551_v62 }
 0x39e   :  { %2184 = vmatprep.subr.bf16.mxu0 %v2552_v63 }
 0x3a1   :  { %2185 = vmatpush3.bf16.msra.mxu0 %v2553_v1 }
 0x3a2   :  { %2186 = vmatprep.subr.bf16.mxu0 %v2554_v2 }
 0x3a5   :  { %2187 = vmatpush3.bf16.msra.mxu0 %v2555_v3 }
 0x3a6   :  { %2212 = vmatprep.subr.bf16.mxu0 %v2797_v4 }
 0x45b   :  { %v1529_v8 = vpop.f32.mrb[8].mxu0 }
 0x45c   :  { %v1530_v9 = vadd.f32 %v1529_v8, %v1328_v6  ;;  %v1531_v10 = vpop.f32.mrb[9].mxu0 }
 0x45d   :  { %v1532_v11 = vadd.f32 %v1531_v10, %v1332_v7  ;;  %v1533_v12 = vpop.f32.mrb[10].mxu0 }
 0x45e   :  { %v1536_v13 = vpack.c.bf16 %v1530_v9, %v1530_v9  ;;  %v1534_v14 = vpop.f32.mrb[11].mxu0 }
 0x45f   :  { %v1537_v15 = vpack.c.bf16 %v1532_v11, %v1532_v11 }
 0x460   :  { %v1538_v18 = vmax.bf16 %v2796_v0, %v1536_v13 }
 0x461   :  { %v1539_v16 = vmax.bf16 %v2796_v0, %v1537_v15 }
 0x463   :  { %1707 = vmatprep.mubr.bf16.mxu0 %v1539_v16 }
 0x464   :  { %1708 = vmatmul.mubr.bf16.vlgmr.msra.gmra.mrb[12].mxu0 %v1538_v18 }
 0x465   :  { %2213 = vmatpush3.bf16.msra.mxu0 %v2556_v17  ;;  %2228 = vmatprep.mubr.msk.bf16.mxu0 %vm2798_vm0, %v2797_v4 }
 0x466   :  { %2214 = vmatprep.subr.bf16.mxu0 %v2797_v4 }
 0x469   :  { %2215 = vmatpush3.bf16.msra.mxu0 %v2557_v19 }
 0x46a   :  { %2216 = vmatprep.subr.bf16.mxu0 %v2797_v4 }
 0x46d   :  { %2217 = vmatpush3.bf16.msra.mxu0 %v2558_v22 }
 0x46e   :  { %2218 = vmatprep.subr.bf16.mxu0 %v2797_v4 }
 0x471   :  { %2219 = vmatpush3.bf16.msra.mxu0 %v2559_v24 }
 0x472   :  { %2220 = vmatprep.subr.bf16.mxu0 %v2797_v4 }
 0x475   :  { %2221 = vmatpush3.bf16.msra.mxu0 %v2560_v20 }
 0x476   :  { %2222 = vmatprep.subr.bf16.mxu0 %v2797_v4 }
 0x479   :  { %2223 = vmatpush3.bf16.msra.mxu0 %v2561_v23 }
 0x47a   :  { %2224 = vmatprep.subr.bf16.mxu0 %v2797_v4 }
 0x47d   :  { %2225 = vmatpush3.bf16.msra.mxu0 %v2562_v25 }
 0x47e   :  { %2226 = vmatprep.subr.bf16.mxu0 %v2797_v4 }
 0x481   :  { %2227 = vmatpush3.bf16.msra.mxu0 %v2563_v26 }
 0x537   :  { %v2188_v33 = vpop.f32.mrb[12].mxu0 }
 0x538   :  { %v2189_v34 = vpop.f32.mrb[13].mxu0 }
 0x539   :  { %v2190_v35 = vadd.f32 %v2189_v34, %v2188_v33  ;;  %v2191_v36 = vpop.f32.mrb[14].mxu0 }
 0x53a   :  { %v2192_v37 = vpop.f32.mrb[15].mxu0 }
 0x53b   :  { %v1710_v38 = vadd.f32 %v2190_v35, %v2137_v21 }
 0x53d   :  { %v1715_v39 = vpack.c.bf16 %v1710_v38, %v1710_v38 }
 0x53f   :  { %v1716_v40 = vmax.bf16 %v2796_v0, %v1715_v39 }
 0x541   :  { %2229 = vmatmul.mubr.bf16.vlgmr.msra.gmra.mrb[16].mxu0 %v1716_v40 }
 0x614   :  { %v1822_v44 = vpop.f32.mrb[16].mxu0 }
 0x615   :  { %v1823_v45 = vadd.f32 %v2154_v43, %v1822_v44  ;;  %v2230_v46 = vpop.f32.mrb[17].mxu0 }
 0x616   :  { %v1825_v47 = vpop.f32.mrb[18].mxu0 }
 0x617   :  { %v1828_v48 = vpack.c.bf16 %v1823_v45, %v1823_v45  ;;  %v2231_v49 = vpop.f32.mrb[19].mxu0 }
 0x619   :  { %v1829_v50 = vmax.bf16 %v2796_v0, %v1828_v48 }
 0x61b   :  { %2249 = vmatmul.mubr.bf16.vlgmr.msra.gmra.mrb[8].mxu1 %v1829_v50 }
 0x6ee   :  { %v1935_v52 = vpop.f32.mrb[8].mxu1 }
 0x6ef   :  { %v1936_v53 = vadd.f32 %v2163_v51, %v1935_v52  ;;  %v2250_v54 = vpop.f32.mrb[9].mxu1 }
 0x6f0   :  { %v1938_v55 = vpop.f32.mrb[10].mxu1 }
 0x6f1   :  { %1941 = vst [vmem:[#allocation16] sm:$0xff] %v1936_v53  ;;  %v2251_v56 = vpop.f32.mrb[11].mxu1 }
 0x6f2   :  { %2759 = shalt.err (!%p2756_p12)
}
 0x6f3   :  { %s3103_s21 = sld [smem:[#allocation23_spill]] }
 0x6f9   :  { %s2760_s14 = scalar_lea.hbm %s3103_s21, 128 }
 0x6fa   :  { %p2761_p13 = scmp.ne.s32.totalorder %s3103_s21, %s2760_s14  ;;  %p2764_p0 = scmp.lt.u32.totalorder %s2760_s14, %s3103_s21 }
 0x6fc   :  { %p2766_p1 = pnand %p2764_p0, %p2761_p13 }
 0x6fe   :  { %2769 = shalt.err (!%p2766_p1)
}
 0x6ff   :  { %1951 = dma.vmem_to_hbm [thread:$0]  %s1949_s7, 128, %s3103_s21, [#allocation4]  }
 0x700   :  { %2780 = dma.done.wait [#allocation4], 128  }
 0x701   :  { %2781 = vsyncadd [#allocation4], 4294967168 }
 0x702   :  { %1955 = vsyncpa [#allocation3], 1 }
 0x703   :  { %1956 = vsyncpa [#allocation6], 1 }
 0x704   :  { %1957 = vsyncpa [#allocation9], 1 }
 0x705   :  { %1958 = vsyncpa [#allocation12], 1 }
 0x706   :  { %1959 = vsyncpa [#allocation15], 1 }
 0x707   :  { %1960 = vsyncpa [#allocation4], 1 }

</bundles_post_ra>
